<compile_context>
chip_gen: v7x
topology: tpu7x:2x2x1
jax: 0.10.0
libtpu: 0.0.40
codegen_flags: <defaults>
</compile_context>

<pallas_src>
import functools
import math

import jax
import jax.numpy as jnp
from jax import lax
from jax.experimental import pallas as pl
from jax.experimental.pallas import tpu as pltpu


# ----------------------------------------------------------------------------
# In-kernel helpers
# ----------------------------------------------------------------------------
def _layernorm(x, w, b, eps=1e-5):
    mu = jnp.mean(x, axis=-1, keepdims=True)
    var = jnp.mean((x - mu) ** 2, axis=-1, keepdims=True)
    return (x - mu) * lax.rsqrt(var + eps) * w + b


# ----------------------------------------------------------------------------
# Kernel: one grid step == one transformer layer (plus final Linear at l==L-1)
# ----------------------------------------------------------------------------
def transformer_layer_kernel(emb_ref, mask_ref,
                             ln1w_ref, ln1b_ref, wqkv_ref, bqkv_ref,
                             wo_ref, bo_ref, ln2w_ref, ln2b_ref,
                             w12_ref, wf_ref, fw_ref, fb_ref,
                             o_ref, x_scr, attn_scr,
                             *, num_heads, batch, seq):
    """emb_ref : (B*S, D) f32   token embeddings (only consumed at l == 0)
       mask_ref: (S, S)   f32   additive causal mask
       per-layer weights arrive as (1, ...) blocks of the stacked (L, ...) arrays
       fw_ref  : (D, C_pad) f32 final classifier weight (lane-padded)
       o_ref   : (B, C_pad) f32 last-token logits (written at l == L-1)
       x_scr   : (B*S, D)  f32  persistent activation slab across layers
       attn_scr: (B, S, D) f32  per-head output assembly buffer
    """
    l = pl.program_id(0)
    n_layers = pl.num_programs(0)
    B, S, H = batch, seq, num_heads
    D = emb_ref.shape[-1]
    hd = D // H
    dim = w12_ref.shape[-1] // 2
    bf16 = jnp.bfloat16

    @pl.when(l == 0)
    def _init():
        x_scr[...] = emb_ref[...]

    x = x_scr[...]                      # (B*S, D) f32
    mask = mask_ref[...]                # (S, S)   f32, loop-invariant (resident block)

    # ---- LayerNorm 1 + fused QKV projection (scale already folded into Wq/bq) ----
    x_ln = _layernorm(x, ln1w_ref[0], ln1b_ref[0])
    qkv = jnp.dot(x_ln.astype(bf16), wqkv_ref[0],
                  preferred_element_type=jnp.float32) + bqkv_ref[0]     # (B*S, 3D)
    qkv3 = qkv.reshape(B, S, 3 * D)                                     # layout no-op

    # ---- causal multi-head attention: per-head blocks, no replicated K/V,
    #      per-head max + exact divide (f32 softmax) ----
    for h in range(H):
        q_h = qkv3[:, :, h * hd:(h + 1) * hd]                           # (B, S, hd)
        k_h = qkv3[:, :, D + h * hd:D + (h + 1) * hd]
        v_h = qkv3[:, :, 2 * D + h * hd:2 * D + (h + 1) * hd]
        s = jnp.einsum("bqd,bkd->bqk", q_h, k_h,
                       preferred_element_type=jnp.float32) + mask       # (B, S, S)
        s = s - jnp.max(s, axis=-1, keepdims=True)
        p = jnp.exp(s)
        p = p / jnp.sum(p, axis=-1, keepdims=True)
        o_h = jnp.einsum("bqk,bkd->bqd", p, v_h,
                         preferred_element_type=jnp.float32)            # (B, S, hd)
        attn_scr[:, :, h * hd:(h + 1) * hd] = o_h

    attn = attn_scr[...].reshape(B * S, D)                              # layout no-op
    x = x + jnp.dot(attn.astype(bf16), wo_ref[0],
                    preferred_element_type=jnp.float32) + bo_ref[0]

    # ---- LayerNorm 2 + SwiGLU feed-forward (w1 || w2 fused into one matmul) ----
    x_ln = _layernorm(x, ln2w_ref[0], ln2b_ref[0])
    x12 = jnp.dot(x_ln.astype(bf16), w12_ref[0],
                  preferred_element_type=jnp.float32)                   # (B*S, 2*dim)
    x1 = x12[:, :dim]
    x2 = x12[:, dim:]
    f = (x1 * jax.nn.sigmoid(x1)) * x2
    x = x + jnp.dot(f.astype(bf16), wf_ref[0],
                    preferred_element_type=jnp.float32)

    x_scr[...] = x

    # ---- final Linear: last token of each sequence only, lane-dense (padded) output ----
    @pl.when(l == n_layers - 1)
    def _final():
        last = jnp.concatenate(
            [x[b * S + S - 1: b * S + S, :] for b in range(B)], axis=0)  # (B, D)
        o_ref[...] = jnp.dot(last, fw_ref[...],
                             preferred_element_type=jnp.float32) + fb_ref[...]


# ----------------------------------------------------------------------------
# Wrapper: one pallas_call, grid over layers
# ----------------------------------------------------------------------------
def run_fused_transformer(emb, params):
    B, S, D = emb.shape
    H = params["num_heads"]
    L = len(params["layers"])
    C = params["final_w"].shape[1]
    hd = D // H
    assert D % H == 0
    dim = params["layers"][0]["w1"].shape[1]
    scale = 1.0 / math.sqrt(hd)
    C_PAD = 128 * ((C + 127) // 128)
    bf16 = jnp.bfloat16

    # Host-hoisted causal mask, NOT replicated over batch or heads.
    row = jnp.arange(S, dtype=jnp.int32)[:, None]
    col = jnp.arange(S, dtype=jnp.int32)[None, :]
    mask = jnp.where(col > row, jnp.float32(-1e30), jnp.float32(0.0))    # (S, S)

    # Stack per-layer weights on a leading L axis (layer-gridded BlockSpecs below).
    def stack(k):
        return jnp.stack([lp[k] for lp in params["layers"]], axis=0)

    wqkv = stack("wqkv")                                 # (L, D, 3D)
    bqkv = stack("bqkv")                                 # (L, 1, 3D)
    # fold 1/sqrt(head_dim) into the Q columns (removes an in-kernel VPU multiply)
    wqkv = wqkv.at[:, :, :D].multiply(scale)
    bqkv = bqkv.at[:, :, :D].multiply(scale)
    w12 = jnp.concatenate([stack("w1"), stack("w2")], axis=-1)  # (L, D, 2*dim)

    # lane-pad final classifier to 128 for a dense output store
    fw_pad = jnp.zeros((D, C_PAD), jnp.float32).at[:, :C].set(params["final_w"])
    fb_pad = jnp.zeros((1, C_PAD), jnp.float32).at[:, :C].set(params["final_b"])

    kernel = functools.partial(transformer_layer_kernel,
                               num_heads=H, batch=B, seq=S)

    grid_spec = pltpu.PrefetchScalarGridSpec(
        num_scalar_prefetch=0,
        grid=(L,),
        in_specs=[
            pl.BlockSpec((B * S, D), lambda l: (0, 0)),        # emb (resident)
            pl.BlockSpec((S, S), lambda l: (0, 0)),            # causal mask (resident)
            pl.BlockSpec((1, 1, D), lambda l: (l, 0, 0)),      # ln1w
            pl.BlockSpec((1, 1, D), lambda l: (l, 0, 0)),      # ln1b
            pl.BlockSpec((1, D, 3 * D), lambda l: (l, 0, 0)),  # wqkv (bf16)
            pl.BlockSpec((1, 1, 3 * D), lambda l: (l, 0, 0)),  # bqkv
            pl.BlockSpec((1, D, D), lambda l: (l, 0, 0)),      # wo (bf16)
            pl.BlockSpec((1, 1, D), lambda l: (l, 0, 0)),      # bo
            pl.BlockSpec((1, 1, D), lambda l: (l, 0, 0)),      # ln2w
            pl.BlockSpec((1, 1, D), lambda l: (l, 0, 0)),      # ln2b
            pl.BlockSpec((1, D, 2 * dim), lambda l: (l, 0, 0)),  # w1||w2 (bf16)
            pl.BlockSpec((1, dim, D), lambda l: (l, 0, 0)),    # wf (bf16)
            pl.BlockSpec((D, C_PAD), lambda l: (0, 0)),        # final_w (resident)
            pl.BlockSpec((1, C_PAD), lambda l: (0, 0)),        # final_b (resident)
        ],
        out_specs=pl.BlockSpec((B, C_PAD), lambda l: (0, 0)),
        scratch_shapes=[
            pltpu.VMEM((B * S, D), jnp.float32),   # persistent activation slab
            pltpu.VMEM((B, S, D), jnp.float32),    # per-head attention assembly
        ],
    )

    logits_pad = pl.pallas_call(
        kernel,
        out_shape=jax.ShapeDtypeStruct((B, C_PAD), jnp.float32),
        grid_spec=grid_spec,
        compiler_params=pltpu.CompilerParams(
            dimension_semantics=("arbitrary",),
            vmem_limit_bytes=32 * 1024 * 1024),
    )(emb.reshape(B * S, D), mask,
      stack("ln1w"), stack("ln1b"),
      wqkv.astype(bf16), bqkv,
      stack("wo").astype(bf16), stack("bo"),
      stack("ln2w"), stack("ln2b"),
      w12.astype(bf16), stack("wf").astype(bf16),
      fw_pad, fb_pad)

    return logits_pad[:, :C]                      # (B, num_classes), last token only


# ----------------------------------------------------------------------------
# VQVAE2 encoder stand-in (plain JAX, frozen / no-grad in the original)
# ----------------------------------------------------------------------------
def encode_standin(x, enc_w, codebook, beta):
    B, C, H, W = x.shape
    P = 4
    # patchify NCHW -> (B, S, C*P*P)
    xp = x.reshape(B, C, H // P, P, W // P, P)
    xp = xp.transpose(0, 2, 4, 1, 3, 5).reshape(B, (H // P) * (W // P), C * P * P)
    z_e = xp @ enc_w                                         # (B, S, D)
    d2 = (jnp.sum(z_e ** 2, -1, keepdims=True)
          - 2.0 * z_e @ codebook.T + jnp.sum(codebook ** 2, -1))
    idx = jnp.argmin(d2, axis=-1)
    z_q = codebook[idx]                                      # (B, S, D)
    codebook_loss = jnp.mean((z_q - lax.stop_gradient(z_e)) ** 2)
    commit_loss = beta * jnp.mean((lax.stop_gradient(z_q) - z_e) ** 2)
    return z_q, codebook_loss, commit_loss


# ----------------------------------------------------------------------------
# Full GeoTransformer forward
# ----------------------------------------------------------------------------
def geo_transformer_forward(x, params):
    emb, cb_loss, cm_loss = encode_standin(
        x, params["enc_w"], params["codebook"], params["beta"])
    logits_last = run_fused_transformer(emb, params)
    return logits_last, cb_loss + cm_loss


# ----------------------------------------------------------------------------
# Pure-JAX reference (f32 everywhere) for correctness checking
# ----------------------------------------------------------------------------
def _ln_ref(x, w, b):
    mu = x.mean(-1, keepdims=True)
    var = ((x - mu) ** 2).mean(-1, keepdims=True)
    return (x - mu) / jnp.sqrt(var + 1e-5) * w + b


def block_ref(x, p, num_heads):
    B, S, D = x.shape
    hd = D // num_heads
    x_ln = _ln_ref(x, p["ln1w"], p["ln1b"])
    qkv = x_ln @ p["wqkv"] + p["bqkv"]
    q, k, v = jnp.split(qkv, 3, axis=-1)
    q = q.reshape(B, S, num_heads, hd).transpose(0, 2, 1, 3)
    k = k.reshape(B, S, num_heads, hd).transpose(0, 2, 1, 3)
    v = v.reshape(B, S, num_heads, hd).transpose(0, 2, 1, 3)
    scale = 1.0 / (hd ** 0.5)
    s = jnp.einsum("bhqd,bhkd->bhqk", q, k) * scale
    row = lax.broadcasted_iota(jnp.int32, (S, S), 0)
    col = lax.broadcasted_iota(jnp.int32, (S, S), 1)
    s = s + jnp.where(col > row, jnp.float32(-1e30), jnp.float32(0.0))
    p_attn = jax.nn.softmax(s, axis=-1)
    o = jnp.einsum("bhqk,bhkd->bhqd", p_attn, v)
    o = o.transpose(0, 2, 1, 3).reshape(B, S, D)
    x = x + o @ p["wo"] + p["bo"]
    x_ln = _ln_ref(x, p["ln2w"], p["ln2b"])
    x1 = x_ln @ p["w1"]
    x2 = x_ln @ p["w2"]
    ff = ((x1 * jax.nn.sigmoid(x1)) * x2) @ p["wf"]
    return x + ff


def forward_ref(x, params):
    emb, cb_loss, cm_loss = encode_standin(
        x, params["enc_w"], params["codebook"], params["beta"])
    h = emb
    for p in params["layers"]:
        h = block_ref(h, p, params["num_heads"])
    logits = h @ params["final_w"] + params["final_b"][0]
    return logits[:, -1, :], cb_loss + cm_loss


# ----------------------------------------------------------------------------
# Deterministic parameter construction
# ----------------------------------------------------------------------------
def make_params(key, *, in_ch, patch, d, k, num_layers, num_heads, num_classes,
                beta, widening=4):
    keys = jax.random.split(key, 6 + num_layers)
    params = {
        "enc_w": 0.1 * jax.random.normal(keys[0], (in_ch * patch * patch, d), jnp.float32),
        "codebook": 0.5 * jax.random.normal(keys[1], (k, d), jnp.float32),
        "final_w": 0.05 * jax.random.normal(keys[2], (d, num_classes), jnp.float32),
        "final_b": 0.01 * jax.random.normal(keys[3], (1, num_classes), jnp.float32),
        "beta": beta,
        "num_heads": num_heads,
        "layers": [],
    }
    dim = d * widening
    for li in range(num_layers):
        lk = jax.random.split(keys[6 + li], 8)
        params["layers"].append({
            "ln1w": jnp.ones((1, d), jnp.float32),
            "ln1b": jnp.zeros((1, d), jnp.float32),
            "wqkv": 0.05 * jax.random.normal(lk[0], (d, 3 * d), jnp.float32),
            "bqkv": 0.01 * jax.random.normal(lk[1], (1, 3 * d), jnp.float32),
            "wo": 0.05 * jax.random.normal(lk[2], (d, d), jnp.float32),
            "bo": 0.01 * jax.random.normal(lk[3], (1, d), jnp.float32),
            "ln2w": jnp.ones((1, d), jnp.float32),
            "ln2b": jnp.zeros((1, d), jnp.float32),
            "w1": 0.05 * jax.random.normal(lk[4], (d, dim), jnp.float32),
            "w2": 0.05 * jax.random.normal(lk[5], (d, dim), jnp.float32),
            "wf": 0.05 * jax.random.normal(lk[6], (dim, d), jnp.float32),
        })
    return params


# ----------------------------------------------------------------------------
if __name__ == "__main__":
    B, C, H, W = 2, 4, 16, 16     # NCHW input, like the PyTorch module
    PATCH = 4                     # -> seq len S = 16
    D = 32                        # embedding dim d
    K = 8                         # codebook size k
    NUM_LAYERS = 2
    NUM_HEADS = 4
    NUM_CLASSES = 10
    BETA = 0.25

    key = jax.random.PRNGKey(0)
    kx, kp = jax.random.split(key)
    x = jax.random.normal(kx, (B, C, H, W), jnp.float32)
    params = make_params(kp, in_ch=C, patch=PATCH, d=D, k=K,
                         num_layers=NUM_LAYERS, num_heads=NUM_HEADS,
                         num_classes=NUM_CLASSES, beta=BETA)

    logits, vq_loss = geo_transformer_forward(x, params)
    logits = jax.block_until_ready(logits)
    vq_loss = jax.block_until_ready(vq_loss)

    ref_logits, ref_loss = forward_ref(x, params)
    assert logits.shape == (B, NUM_CLASSES)
    # bf16 weights / bf16-cast matmul inputs in the kernel vs. f32 reference
    assert jnp.allclose(logits, ref_logits, atol=2e-2, rtol=2e-2), "logits mismatch"
    assert jnp.allclose(vq_loss, ref_loss, atol=1e-6), "loss mismatch"

    print("KERNEL_OK")
</pallas_src>

<mosaic_0001>
module attributes {stable_mosaic.version = 11 : i64} {
  func.func @transformer_layer_kernel(%arg0: i32, %arg1: memref<32x32xf32, #tpu.memory_space<vmem>>, %arg2: memref<16x16xf32, #tpu.memory_space<vmem>>, %arg3: memref<1x1x32xf32, #tpu.memory_space<vmem>>, %arg4: memref<1x1x32xf32, #tpu.memory_space<vmem>>, %arg5: memref<1x32x96xbf16, #tpu.memory_space<vmem>>, %arg6: memref<1x1x96xf32, #tpu.memory_space<vmem>>, %arg7: memref<1x32x32xbf16, #tpu.memory_space<vmem>>, %arg8: memref<1x1x32xf32, #tpu.memory_space<vmem>>, %arg9: memref<1x1x32xf32, #tpu.memory_space<vmem>>, %arg10: memref<1x1x32xf32, #tpu.memory_space<vmem>>, %arg11: memref<1x32x256xbf16, #tpu.memory_space<vmem>>, %arg12: memref<1x128x32xbf16, #tpu.memory_space<vmem>>, %arg13: memref<32x128xf32, #tpu.memory_space<vmem>>, %arg14: memref<1x128xf32, #tpu.memory_space<vmem>>, %arg15: memref<2x128xf32, #tpu.memory_space<vmem>>, %arg16: memref<32x32xf32, #tpu.memory_space<vmem>>, %arg17: memref<2x16x32xf32, #tpu.memory_space<vmem>>) attributes {dimension_semantics = [#tpu.dimension_semantics<arbitrary>], iteration_bounds = array<i64: 2>, scalar_prefetch = 0 : i64, scratch_operands = 2 : i64, tpu.core_type = #tpu.core_type<tc>, window_params = [{pipeline_mode = #tpu.pipeline_mode<synchronous>, transform_indices = @transform_0, window_bounds = array<i64: 32, 32>}, {pipeline_mode = #tpu.pipeline_mode<synchronous>, transform_indices = @transform_1, window_bounds = array<i64: 16, 16>}, {transform_indices = @transform_2, window_bounds = array<i64: 1, 1, 32>}, {transform_indices = @transform_3, window_bounds = array<i64: 1, 1, 32>}, {transform_indices = @transform_4, window_bounds = array<i64: 1, 32, 96>}, {transform_indices = @transform_5, window_bounds = array<i64: 1, 1, 96>}, {transform_indices = @transform_6, window_bounds = array<i64: 1, 32, 32>}, {transform_indices = @transform_7, window_bounds = array<i64: 1, 1, 32>}, {transform_indices = @transform_8, window_bounds = array<i64: 1, 1, 32>}, {transform_indices = @transform_9, window_bounds = array<i64: 1, 1, 32>}, {transform_indices = @transform_10, window_bounds = array<i64: 1, 32, 256>}, {transform_indices = @transform_11, window_bounds = array<i64: 1, 128, 32>}, {pipeline_mode = #tpu.pipeline_mode<synchronous>, transform_indices = @transform_12, window_bounds = array<i64: 32, 128>}, {pipeline_mode = #tpu.pipeline_mode<synchronous>, transform_indices = @transform_13, window_bounds = array<i64: 1, 128>}, {pipeline_mode = #tpu.pipeline_mode<synchronous>, transform_indices = @transform_14, window_bounds = array<i64: 2, 128>}]} {
    %c0_i32 = arith.constant 0 : i32
    %0 = arith.cmpi eq, %arg0, %c0_i32 : i32
    %1 = arith.extui %0 : i1 to i32
    %c0_i32_0 = arith.constant 0 : i32
    %2 = arith.cmpi ne, %1, %c0_i32_0 : i32
    scf.if %2 {
      %c0_79 = arith.constant 0 : index
      %c0_80 = arith.constant 0 : index
      %171 = vector.load %arg1[%c0_79, %c0_80] : memref<32x32xf32, #tpu.memory_space<vmem>>, vector<32x32xf32>
      %c0_81 = arith.constant 0 : index
      %c0_82 = arith.constant 0 : index
      %172 = vector.load %arg16[%c0_81, %c0_82] : memref<32x32xf32, #tpu.memory_space<vmem>>, vector<32x32xf32>
      tpu.vector_store %arg16[%c0_81, %c0_82], %171 {strides = array<i32>} : memref<32x32xf32, #tpu.memory_space<vmem>>, vector<32x32xf32>,
    } else {
    }
    %c0 = arith.constant 0 : index
    %c0_1 = arith.constant 0 : index
    %3 = vector.load %arg16[%c0, %c0_1] : memref<32x32xf32, #tpu.memory_space<vmem>>, vector<32x32xf32>
    %c0_2 = arith.constant 0 : index
    %c0_3 = arith.constant 0 : index
    %4 = vector.load %arg2[%c0_2, %c0_3] : memref<16x16xf32, #tpu.memory_space<vmem>>, vector<16x16xf32>
    %c0_4 = arith.constant 0 : index
    %c0_5 = arith.constant 0 : index
    %c0_6 = arith.constant 0 : index
    %5 = vector.load %arg3[%c0_4, %c0_5, %c0_6] : memref<1x1x32xf32, #tpu.memory_space<vmem>>, vector<1x1x32xf32>
    %6 = vector.shape_cast %5 : vector<1x1x32xf32> to vector<1x32xf32>
    %c0_7 = arith.constant 0 : index
    %c0_8 = arith.constant 0 : index
    %c0_9 = arith.constant 0 : index
    %7 = vector.load %arg4[%c0_7, %c0_8, %c0_9] : memref<1x1x32xf32, #tpu.memory_space<vmem>>, vector<1x1x32xf32>
    %8 = vector.shape_cast %7 : vector<1x1x32xf32> to vector<1x32xf32>
    %cst = arith.constant dense<0.000000e+00> : vector<32xf32>
    %9 = vector.multi_reduction <add>, %3, %cst [1] : vector<32x32xf32> to vector<32xf32>
    %10 = vector.shape_cast %9 : vector<32xf32> to vector<32x1xf32>
    %cst_10 = arith.constant 3.200000e+01 : f32
    %11 = vector.broadcast %cst_10 : f32 to vector<32x1xf32>
    %12 = arith.divf %10, %11 : vector<32x1xf32>
    %13 = vector.broadcast %12 : vector<32x1xf32> to vector<32x32xf32>
    %14 = arith.subf %3, %13 : vector<32x32xf32>
    %15 = arith.mulf %14, %14 : vector<32x32xf32>
    %cst_11 = arith.constant dense<0.000000e+00> : vector<32xf32>
    %16 = vector.multi_reduction <add>, %15, %cst_11 [1] : vector<32x32xf32> to vector<32xf32>
    %17 = vector.shape_cast %16 : vector<32xf32> to vector<32x1xf32>
    %cst_12 = arith.constant 3.200000e+01 : f32
    %18 = vector.broadcast %cst_12 : f32 to vector<32x1xf32>
    %19 = arith.divf %17, %18 : vector<32x1xf32>
    %20 = vector.broadcast %12 : vector<32x1xf32> to vector<32x32xf32>
    %21 = arith.subf %3, %20 : vector<32x32xf32>
    %cst_13 = arith.constant 9.99999974E-6 : f32
    %22 = vector.broadcast %cst_13 : f32 to vector<32x1xf32>
    %23 = arith.addf %19, %22 : vector<32x1xf32>
    %24 = math.rsqrt %23 : vector<32x1xf32>
    %25 = vector.broadcast %24 : vector<32x1xf32> to vector<32x32xf32>
    %26 = arith.mulf %21, %25 : vector<32x32xf32>
    %27 = vector.broadcast %6 : vector<1x32xf32> to vector<32x32xf32>
    %28 = arith.mulf %26, %27 : vector<32x32xf32>
    %29 = vector.broadcast %8 : vector<1x32xf32> to vector<32x32xf32>
    %30 = arith.addf %28, %29 : vector<32x32xf32>
    %31 = arith.truncf %30 : vector<32x32xf32> to vector<32x32xbf16>
    %c0_14 = arith.constant 0 : index
    %c0_15 = arith.constant 0 : index
    %c0_16 = arith.constant 0 : index
    %32 = vector.load %arg5[%c0_14, %c0_15, %c0_16] : memref<1x32x96xbf16, #tpu.memory_space<vmem>>, vector<1x32x96xbf16>
    %33 = vector.shape_cast %32 : vector<1x32x96xbf16> to vector<32x96xbf16>
    %cst_17 = arith.constant dense<0.000000e+00> : vector<32x96xf32>
    %34 = tpu.matmul %31, %33, %cst_17 {dimension_numbers = #tpu.dot_dimension_numbers<[1], [0], [0], [1], [0, 0, 1, 1], [], []>} : vector<32x32xbf16>, vector<32x96xbf16>, vector<32x96xf32> -> vector<32x96xf32>
    %c0_18 = arith.constant 0 : index
    %c0_19 = arith.constant 0 : index
    %c0_20 = arith.constant 0 : index
    %35 = vector.load %arg6[%c0_18, %c0_19, %c0_20] : memref<1x1x96xf32, #tpu.memory_space<vmem>>, vector<1x1x96xf32>
    %36 = vector.shape_cast %35 : vector<1x1x96xf32> to vector<1x96xf32>
    %37 = vector.broadcast %36 : vector<1x96xf32> to vector<32x96xf32>
    %38 = arith.addf %34, %37 : vector<32x96xf32>
    %39 = vector.shape_cast %38 : vector<32x96xf32> to vector<2x16x96xf32>
    %40 = vector.extract_strided_slice %39 {offsets = [0, 0, 0], sizes = [2, 16, 8], strides = [1, 1, 1]} : vector<2x16x96xf32> to vector<2x16x8xf32>
    %41 = vector.extract_strided_slice %39 {offsets = [0, 0, 32], sizes = [2, 16, 8], strides = [1, 1, 1]} : vector<2x16x96xf32> to vector<2x16x8xf32>
    %42 = vector.extract_strided_slice %39 {offsets = [0, 0, 64], sizes = [2, 16, 8], strides = [1, 1, 1]} : vector<2x16x96xf32> to vector<2x16x8xf32>
    "tpu.trace_start"() <{level = 10 : i32, message = "bqd,bkd->bqk"}> : () -> ()
    %cst_21 = arith.constant dense<0.000000e+00> : vector<2x16x16xf32>
    %43 = tpu.matmul %40, %41, %cst_21 {dimension_numbers = #tpu.dot_dimension_numbers<[2], [2], [1], [1], [0, 0, 0, 1, 1, 1], [0], [0]>} : vector<2x16x8xf32>, vector<2x16x8xf32>, vector<2x16x16xf32> -> vector<2x16x16xf32>
    "tpu.trace_stop"() : () -> ()
    %44 = vector.shape_cast %4 : vector<16x16xf32> to vector<1x16x16xf32>
    %45 = vector.broadcast %44 : vector<1x16x16xf32> to vector<2x16x16xf32>
    %46 = arith.addf %43, %45 : vector<2x16x16xf32>
    %cst_22 = arith.constant dense<0xFF800000> : vector<2x16xf32>
    %47 = vector.multi_reduction <maximumf>, %46, %cst_22 [2] : vector<2x16x16xf32> to vector<2x16xf32>
    %48 = vector.shape_cast %47 : vector<2x16xf32> to vector<2x16x1xf32>
    %49 = vector.broadcast %48 : vector<2x16x1xf32> to vector<2x16x16xf32>
    %50 = arith.subf %46, %49 : vector<2x16x16xf32>
    %51 = math.exp %50 : vector<2x16x16xf32>
    %cst_23 = arith.constant dense<0.000000e+00> : vector<2x16xf32>
    %52 = vector.multi_reduction <add>, %51, %cst_23 [2] : vector<2x16x16xf32> to vector<2x16xf32>
    %53 = vector.shape_cast %52 : vector<2x16xf32> to vector<2x16x1xf32>
    %54 = vector.broadcast %53 : vector<2x16x1xf32> to vector<2x16x16xf32>
    %55 = arith.divf %51, %54 : vector<2x16x16xf32>
    "tpu.trace_start"() <{level = 10 : i32, message = "bqk,bkd->bqd"}> : () -> ()
    %cst_24 = arith.constant dense<0.000000e+00> : vector<2x16x8xf32>
    %56 = tpu.matmul %55, %42, %cst_24 {dimension_numbers = #tpu.dot_dimension_numbers<[2], [1], [1], [2], [0, 0, 0, 1, 1, 2], [0], [0]>} : vector<2x16x16xf32>, vector<2x16x8xf32>, vector<2x16x8xf32> -> vector<2x16x8xf32>
    "tpu.trace_stop"() : () -> ()
    %c0_25 = arith.constant 0 : index
    %c0_26 = arith.constant 0 : index
    %c0_27 = arith.constant 0 : index
    %57 = vector.load %arg17[%c0_25, %c0_26, %c0_27] : memref<2x16x32xf32, #tpu.memory_space<vmem>>, vector<2x16x8xf32>
    tpu.vector_store %arg17[%c0_25, %c0_26, %c0_27], %56 {strides = array<i32>} : memref<2x16x32xf32, #tpu.memory_space<vmem>>, vector<2x16x8xf32>,
    %58 = vector.extract_strided_slice %39 {offsets = [0, 0, 8], sizes = [2, 16, 8], strides = [1, 1, 1]} : vector<2x16x96xf32> to vector<2x16x8xf32>
    %59 = vector.extract_strided_slice %39 {offsets = [0, 0, 40], sizes = [2, 16, 8], strides = [1, 1, 1]} : vector<2x16x96xf32> to vector<2x16x8xf32>
    %60 = vector.extract_strided_slice %39 {offsets = [0, 0, 72], sizes = [2, 16, 8], strides = [1, 1, 1]} : vector<2x16x96xf32> to vector<2x16x8xf32>
    "tpu.trace_start"() <{level = 10 : i32, message = "bqd,bkd->bqk"}> : () -> ()
    %cst_28 = arith.constant dense<0.000000e+00> : vector<2x16x16xf32>
    %61 = tpu.matmul %58, %59, %cst_28 {dimension_numbers = #tpu.dot_dimension_numbers<[2], [2], [1], [1], [0, 0, 0, 1, 1, 1], [0], [0]>} : vector<2x16x8xf32>, vector<2x16x8xf32>, vector<2x16x16xf32> -> vector<2x16x16xf32>
    "tpu.trace_stop"() : () -> ()
    %62 = vector.shape_cast %4 : vector<16x16xf32> to vector<1x16x16xf32>
    %63 = vector.broadcast %62 : vector<1x16x16xf32> to vector<2x16x16xf32>
    %64 = arith.addf %61, %63 : vector<2x16x16xf32>
    %cst_29 = arith.constant dense<0xFF800000> : vector<2x16xf32>
    %65 = vector.multi_reduction <maximumf>, %64, %cst_29 [2] : vector<2x16x16xf32> to vector<2x16xf32>
    %66 = vector.shape_cast %65 : vector<2x16xf32> to vector<2x16x1xf32>
    %67 = vector.broadcast %66 : vector<2x16x1xf32> to vector<2x16x16xf32>
    %68 = arith.subf %64, %67 : vector<2x16x16xf32>
    %69 = math.exp %68 : vector<2x16x16xf32>
    %cst_30 = arith.constant dense<0.000000e+00> : vector<2x16xf32>
    %70 = vector.multi_reduction <add>, %69, %cst_30 [2] : vector<2x16x16xf32> to vector<2x16xf32>
    %71 = vector.shape_cast %70 : vector<2x16xf32> to vector<2x16x1xf32>
    %72 = vector.broadcast %71 : vector<2x16x1xf32> to vector<2x16x16xf32>
    %73 = arith.divf %69, %72 : vector<2x16x16xf32>
    "tpu.trace_start"() <{level = 10 : i32, message = "bqk,bkd->bqd"}> : () -> ()
    %cst_31 = arith.constant dense<0.000000e+00> : vector<2x16x8xf32>
    %74 = tpu.matmul %73, %60, %cst_31 {dimension_numbers = #tpu.dot_dimension_numbers<[2], [1], [1], [2], [0, 0, 0, 1, 1, 2], [0], [0]>} : vector<2x16x16xf32>, vector<2x16x8xf32>, vector<2x16x8xf32> -> vector<2x16x8xf32>
    "tpu.trace_stop"() : () -> ()
    %c0_32 = arith.constant 0 : index
    %c0_33 = arith.constant 0 : index
    %c8 = arith.constant 8 : index
    %75 = vector.load %arg17[%c0_32, %c0_33, %c8] : memref<2x16x32xf32, #tpu.memory_space<vmem>>, vector<2x16x8xf32>
    tpu.vector_store %arg17[%c0_32, %c0_33, %c8], %74 {strides = array<i32>} : memref<2x16x32xf32, #tpu.memory_space<vmem>>, vector<2x16x8xf32>,
    %76 = vector.extract_strided_slice %39 {offsets = [0, 0, 16], sizes = [2, 16, 8], strides = [1, 1, 1]} : vector<2x16x96xf32> to vector<2x16x8xf32>
    %77 = vector.extract_strided_slice %39 {offsets = [0, 0, 48], sizes = [2, 16, 8], strides = [1, 1, 1]} : vector<2x16x96xf32> to vector<2x16x8xf32>
    %78 = vector.extract_strided_slice %39 {offsets = [0, 0, 80], sizes = [2, 16, 8], strides = [1, 1, 1]} : vector<2x16x96xf32> to vector<2x16x8xf32>
    "tpu.trace_start"() <{level = 10 : i32, message = "bqd,bkd->bqk"}> : () -> ()
    %cst_34 = arith.constant dense<0.000000e+00> : vector<2x16x16xf32>
    %79 = tpu.matmul %76, %77, %cst_34 {dimension_numbers = #tpu.dot_dimension_numbers<[2], [2], [1], [1], [0, 0, 0, 1, 1, 1], [0], [0]>} : vector<2x16x8xf32>, vector<2x16x8xf32>, vector<2x16x16xf32> -> vector<2x16x16xf32>
    "tpu.trace_stop"() : () -> ()
    %80 = vector.shape_cast %4 : vector<16x16xf32> to vector<1x16x16xf32>
    %81 = vector.broadcast %80 : vector<1x16x16xf32> to vector<2x16x16xf32>
    %82 = arith.addf %79, %81 : vector<2x16x16xf32>
    %cst_35 = arith.constant dense<0xFF800000> : vector<2x16xf32>
    %83 = vector.multi_reduction <maximumf>, %82, %cst_35 [2] : vector<2x16x16xf32> to vector<2x16xf32>
    %84 = vector.shape_cast %83 : vector<2x16xf32> to vector<2x16x1xf32>
    %85 = vector.broadcast %84 : vector<2x16x1xf32> to vector<2x16x16xf32>
    %86 = arith.subf %82, %85 : vector<2x16x16xf32>
    %87 = math.exp %86 : vector<2x16x16xf32>
    %cst_36 = arith.constant dense<0.000000e+00> : vector<2x16xf32>
    %88 = vector.multi_reduction <add>, %87, %cst_36 [2] : vector<2x16x16xf32> to vector<2x16xf32>
    %89 = vector.shape_cast %88 : vector<2x16xf32> to vector<2x16x1xf32>
    %90 = vector.broadcast %89 : vector<2x16x1xf32> to vector<2x16x16xf32>
    %91 = arith.divf %87, %90 : vector<2x16x16xf32>
    "tpu.trace_start"() <{level = 10 : i32, message = "bqk,bkd->bqd"}> : () -> ()
    %cst_37 = arith.constant dense<0.000000e+00> : vector<2x16x8xf32>
    %92 = tpu.matmul %91, %78, %cst_37 {dimension_numbers = #tpu.dot_dimension_numbers<[2], [1], [1], [2], [0, 0, 0, 1, 1, 2], [0], [0]>} : vector<2x16x16xf32>, vector<2x16x8xf32>, vector<2x16x8xf32> -> vector<2x16x8xf32>
    "tpu.trace_stop"() : () -> ()
    %c0_38 = arith.constant 0 : index
    %c0_39 = arith.constant 0 : index
    %c16 = arith.constant 16 : index
    %93 = vector.load %arg17[%c0_38, %c0_39, %c16] : memref<2x16x32xf32, #tpu.memory_space<vmem>>, vector<2x16x8xf32>
    tpu.vector_store %arg17[%c0_38, %c0_39, %c16], %92 {strides = array<i32>} : memref<2x16x32xf32, #tpu.memory_space<vmem>>, vector<2x16x8xf32>,
    %94 = vector.extract_strided_slice %39 {offsets = [0, 0, 24], sizes = [2, 16, 8], strides = [1, 1, 1]} : vector<2x16x96xf32> to vector<2x16x8xf32>
    %95 = vector.extract_strided_slice %39 {offsets = [0, 0, 56], sizes = [2, 16, 8], strides = [1, 1, 1]} : vector<2x16x96xf32> to vector<2x16x8xf32>
    %96 = vector.extract_strided_slice %39 {offsets = [0, 0, 88], sizes = [2, 16, 8], strides = [1, 1, 1]} : vector<2x16x96xf32> to vector<2x16x8xf32>
    "tpu.trace_start"() <{level = 10 : i32, message = "bqd,bkd->bqk"}> : () -> ()
    %cst_40 = arith.constant dense<0.000000e+00> : vector<2x16x16xf32>
    %97 = tpu.matmul %94, %95, %cst_40 {dimension_numbers = #tpu.dot_dimension_numbers<[2], [2], [1], [1], [0, 0, 0, 1, 1, 1], [0], [0]>} : vector<2x16x8xf32>, vector<2x16x8xf32>, vector<2x16x16xf32> -> vector<2x16x16xf32>
    "tpu.trace_stop"() : () -> ()
    %98 = vector.shape_cast %4 : vector<16x16xf32> to vector<1x16x16xf32>
    %99 = vector.broadcast %98 : vector<1x16x16xf32> to vector<2x16x16xf32>
    %100 = arith.addf %97, %99 : vector<2x16x16xf32>
    %cst_41 = arith.constant dense<0xFF800000> : vector<2x16xf32>
    %101 = vector.multi_reduction <maximumf>, %100, %cst_41 [2] : vector<2x16x16xf32> to vector<2x16xf32>
    %102 = vector.shape_cast %101 : vector<2x16xf32> to vector<2x16x1xf32>
    %103 = vector.broadcast %102 : vector<2x16x1xf32> to vector<2x16x16xf32>
    %104 = arith.subf %100, %103 : vector<2x16x16xf32>
    %105 = math.exp %104 : vector<2x16x16xf32>
    %cst_42 = arith.constant dense<0.000000e+00> : vector<2x16xf32>
    %106 = vector.multi_reduction <add>, %105, %cst_42 [2] : vector<2x16x16xf32> to vector<2x16xf32>
    %107 = vector.shape_cast %106 : vector<2x16xf32> to vector<2x16x1xf32>
    %108 = vector.broadcast %107 : vector<2x16x1xf32> to vector<2x16x16xf32>
    %109 = arith.divf %105, %108 : vector<2x16x16xf32>
    "tpu.trace_start"() <{level = 10 : i32, message = "bqk,bkd->bqd"}> : () -> ()
    %cst_43 = arith.constant dense<0.000000e+00> : vector<2x16x8xf32>
    %110 = tpu.matmul %109, %96, %cst_43 {dimension_numbers = #tpu.dot_dimension_numbers<[2], [1], [1], [2], [0, 0, 0, 1, 1, 2], [0], [0]>} : vector<2x16x16xf32>, vector<2x16x8xf32>, vector<2x16x8xf32> -> vector<2x16x8xf32>
    "tpu.trace_stop"() : () -> ()
    %c0_44 = arith.constant 0 : index
    %c0_45 = arith.constant 0 : index
    %c24 = arith.constant 24 : index
    %111 = vector.load %arg17[%c0_44, %c0_45, %c24] : memref<2x16x32xf32, #tpu.memory_space<vmem>>, vector<2x16x8xf32>
    tpu.vector_store %arg17[%c0_44, %c0_45, %c24], %110 {strides = array<i32>} : memref<2x16x32xf32, #tpu.memory_space<vmem>>, vector<2x16x8xf32>,
    %c0_46 = arith.constant 0 : index
    %c0_47 = arith.constant 0 : index
    %c0_48 = arith.constant 0 : index
    %112 = vector.load %arg17[%c0_46, %c0_47, %c0_48] : memref<2x16x32xf32, #tpu.memory_space<vmem>>, vector<2x16x32xf32>
    %113 = vector.shape_cast %112 : vector<2x16x32xf32> to vector<32x32xf32>
    %114 = arith.truncf %113 : vector<32x32xf32> to vector<32x32xbf16>
    %c0_49 = arith.constant 0 : index
    %c0_50 = arith.constant 0 : index
    %c0_51 = arith.constant 0 : index
    %115 = vector.load %arg7[%c0_49, %c0_50, %c0_51] : memref<1x32x32xbf16, #tpu.memory_space<vmem>>, vector<1x32x32xbf16>
    %116 = vector.shape_cast %115 : vector<1x32x32xbf16> to vector<32x32xbf16>
    %cst_52 = arith.constant dense<0.000000e+00> : vector<32x32xf32>
    %117 = tpu.matmul %114, %116, %cst_52 {dimension_numbers = #tpu.dot_dimension_numbers<[1], [0], [0], [1], [0, 0, 1, 1], [], []>} : vector<32x32xbf16>, vector<32x32xbf16>, vector<32x32xf32> -> vector<32x32xf32>
    %118 = arith.addf %3, %117 : vector<32x32xf32>
    %c0_53 = arith.constant 0 : index
    %c0_54 = arith.constant 0 : index
    %c0_55 = arith.constant 0 : index
    %119 = vector.load %arg8[%c0_53, %c0_54, %c0_55] : memref<1x1x32xf32, #tpu.memory_space<vmem>>, vector<1x1x32xf32>
    %120 = vector.shape_cast %119 : vector<1x1x32xf32> to vector<1x32xf32>
    %121 = vector.broadcast %120 : vector<1x32xf32> to vector<32x32xf32>
    %122 = arith.addf %118, %121 : vector<32x32xf32>
    %c0_56 = arith.constant 0 : index
    %c0_57 = arith.constant 0 : index
    %c0_58 = arith.constant 0 : index
    %123 = vector.load %arg9[%c0_56, %c0_57, %c0_58] : memref<1x1x32xf32, #tpu.memory_space<vmem>>, vector<1x1x32xf32>
    %124 = vector.shape_cast %123 : vector<1x1x32xf32> to vector<1x32xf32>
    %c0_59 = arith.constant 0 : index
    %c0_60 = arith.constant 0 : index
    %c0_61 = arith.constant 0 : index
    %125 = vector.load %arg10[%c0_59, %c0_60, %c0_61] : memref<1x1x32xf32, #tpu.memory_space<vmem>>, vector<1x1x32xf32>
    %126 = vector.shape_cast %125 : vector<1x1x32xf32> to vector<1x32xf32>
    %cst_62 = arith.constant dense<0.000000e+00> : vector<32xf32>
    %127 = vector.multi_reduction <add>, %122, %cst_62 [1] : vector<32x32xf32> to vector<32xf32>
    %128 = vector.shape_cast %127 : vector<32xf32> to vector<32x1xf32>
    %cst_63 = arith.constant 3.200000e+01 : f32
    %129 = vector.broadcast %cst_63 : f32 to vector<32x1xf32>
    %130 = arith.divf %128, %129 : vector<32x1xf32>
    %131 = vector.broadcast %130 : vector<32x1xf32> to vector<32x32xf32>
    %132 = arith.subf %122, %131 : vector<32x32xf32>
    %133 = arith.mulf %132, %132 : vector<32x32xf32>
    %cst_64 = arith.constant dense<0.000000e+00> : vector<32xf32>
    %134 = vector.multi_reduction <add>, %133, %cst_64 [1] : vector<32x32xf32> to vector<32xf32>
    %135 = vector.shape_cast %134 : vector<32xf32> to vector<32x1xf32>
    %cst_65 = arith.constant 3.200000e+01 : f32
    %136 = vector.broadcast %cst_65 : f32 to vector<32x1xf32>
    %137 = arith.divf %135, %136 : vector<32x1xf32>
    %138 = vector.broadcast %130 : vector<32x1xf32> to vector<32x32xf32>
    %139 = arith.subf %122, %138 : vector<32x32xf32>
    %cst_66 = arith.constant 9.99999974E-6 : f32
    %140 = vector.broadcast %cst_66 : f32 to vector<32x1xf32>
    %141 = arith.addf %137, %140 : vector<32x1xf32>
    %142 = math.rsqrt %141 : vector<32x1xf32>
    %143 = vector.broadcast %142 : vector<32x1xf32> to vector<32x32xf32>
    %144 = arith.mulf %139, %143 : vector<32x32xf32>
    %145 = vector.broadcast %124 : vector<1x32xf32> to vector<32x32xf32>
    %146 = arith.mulf %144, %145 : vector<32x32xf32>
    %147 = vector.broadcast %126 : vector<1x32xf32> to vector<32x32xf32>
    %148 = arith.addf %146, %147 : vector<32x32xf32>
    %149 = arith.truncf %148 : vector<32x32xf32> to vector<32x32xbf16>
    %c0_67 = arith.constant 0 : index
    %c0_68 = arith.constant 0 : index
    %c0_69 = arith.constant 0 : index
    %150 = vector.load %arg11[%c0_67, %c0_68, %c0_69] : memref<1x32x256xbf16, #tpu.memory_space<vmem>>, vector<1x32x256xbf16>
    %151 = vector.shape_cast %150 : vector<1x32x256xbf16> to vector<32x256xbf16>
    %cst_70 = arith.constant dense<0.000000e+00> : vector<32x256xf32>
    %152 = tpu.matmul %149, %151, %cst_70 {dimension_numbers = #tpu.dot_dimension_numbers<[1], [0], [0], [1], [0, 0, 1, 1], [], []>} : vector<32x32xbf16>, vector<32x256xbf16>, vector<32x256xf32> -> vector<32x256xf32>
    %153 = vector.extract_strided_slice %152 {offsets = [0, 0], sizes = [32, 128], strides = [1, 1]} : vector<32x256xf32> to vector<32x128xf32>
    %154 = vector.extract_strided_slice %152 {offsets = [0, 128], sizes = [32, 128], strides = [1, 1]} : vector<32x256xf32> to vector<32x128xf32>
    %155 = arith.negf %153 : vector<32x128xf32>
    %156 = math.exp %155 : vector<32x128xf32>
    %cst_71 = arith.constant 1.000000e+00 : f32
    %157 = vector.broadcast %cst_71 : f32 to vector<32x128xf32>
    %158 = arith.addf %157, %156 : vector<32x128xf32>
    %159 = arith.divf %157, %158 : vector<32x128xf32>
    %160 = arith.mulf %153, %159 : vector<32x128xf32>
    %161 = arith.mulf %160, %154 : vector<32x128xf32>
    %162 = arith.truncf %161 : vector<32x128xf32> to vector<32x128xbf16>
    %c0_72 = arith.constant 0 : index
    %c0_73 = arith.constant 0 : index
    %c0_74 = arith.constant 0 : index
    %163 = vector.load %arg12[%c0_72, %c0_73, %c0_74] : memref<1x128x32xbf16, #tpu.memory_space<vmem>>, vector<1x128x32xbf16>
    %164 = vector.shape_cast %163 : vector<1x128x32xbf16> to vector<128x32xbf16>
    %cst_75 = arith.constant dense<0.000000e+00> : vector<32x32xf32>
    %165 = tpu.matmul %162, %164, %cst_75 {dimension_numbers = #tpu.dot_dimension_numbers<[1], [0], [0], [1], [0, 0, 1, 1], [], []>} : vector<32x128xbf16>, vector<128x32xbf16>, vector<32x32xf32> -> vector<32x32xf32>
    %166 = arith.addf %122, %165 : vector<32x32xf32>
    %c0_76 = arith.constant 0 : index
    %c0_77 = arith.constant 0 : index
    %167 = vector.load %arg16[%c0_76, %c0_77] : memref<32x32xf32, #tpu.memory_space<vmem>>, vector<32x32xf32>
    tpu.vector_store %arg16[%c0_76, %c0_77], %166 {strides = array<i32>} : memref<32x32xf32, #tpu.memory_space<vmem>>, vector<32x32xf32>,
    %c1_i32 = arith.constant 1 : i32
    %168 = arith.cmpi eq, %arg0, %c1_i32 : i32
    %169 = arith.extui %168 : i1 to i32
    %c0_i32_78 = arith.constant 0 : i32
    %170 = arith.cmpi ne, %169, %c0_i32_78 : i32
    scf.if %170 {
      %171 = vector.extract_strided_slice %166 {offsets = [15, 0], sizes = [1, 32], strides = [1, 1]} : vector<32x32xf32> to vector<1x32xf32>
      %172 = vector.extract_strided_slice %166 {offsets = [31, 0], sizes = [1, 32], strides = [1, 1]} : vector<32x32xf32> to vector<1x32xf32>
      %173 = tpu.concatenate %171, %172 in 0 : vector<1x32xf32>, vector<1x32xf32> -> vector<2x32xf32>
      %c0_79 = arith.constant 0 : index
      %c0_80 = arith.constant 0 : index
      %174 = vector.load %arg13[%c0_79, %c0_80] : memref<32x128xf32, #tpu.memory_space<vmem>>, vector<32x128xf32>
      %cst_81 = arith.constant dense<0.000000e+00> : vector<2x128xf32>
      %175 = tpu.matmul %173, %174, %cst_81 {dimension_numbers = #tpu.dot_dimension_numbers<[1], [0], [0], [1], [0, 0, 1, 1], [], []>} : vector<2x32xf32>, vector<32x128xf32>, vector<2x128xf32> -> vector<2x128xf32>
      %c0_82 = arith.constant 0 : index
      %c0_83 = arith.constant 0 : index
      %176 = vector.load %arg14[%c0_82, %c0_83] : memref<1x128xf32, #tpu.memory_space<vmem>>, vector<1x128xf32>
      %177 = vector.broadcast %176 : vector<1x128xf32> to vector<2x128xf32>
      %178 = arith.addf %175, %177 : vector<2x128xf32>
      %c0_84 = arith.constant 0 : index
      %c0_85 = arith.constant 0 : index
      %179 = vector.load %arg15[%c0_84, %c0_85] : memref<2x128xf32, #tpu.memory_space<vmem>>, vector<2x128xf32>
      tpu.vector_store %arg15[%c0_84, %c0_85], %178 {strides = array<i32>} : memref<2x128xf32, #tpu.memory_space<vmem>>, vector<2x128xf32>,
    } else {
    }
    return
  }
  func.func @transform_0(%arg0: i32) -> (i32, i32) {
    %c0_i32 = arith.constant 0 : i32
    %c0_i32_0 = arith.constant 0 : i32
    %c0_i32_1 = arith.constant 0 : i32
    return %c0_i32, %c0_i32_0 : i32, i32
  }
  func.func @transform_1(%arg0: i32) -> (i32, i32) {
    %c0_i32 = arith.constant 0 : i32
    %c0_i32_0 = arith.constant 0 : i32
    %c0_i32_1 = arith.constant 0 : i32
    return %c0_i32, %c0_i32_0 : i32, i32
  }
  func.func @transform_2(%arg0: i32) -> (i32, i32, i32) {
    %c0_i32 = arith.constant 0 : i32
    %c0_i32_0 = arith.constant 0 : i32
    %c0_i32_1 = arith.constant 0 : i32
    return %arg0, %c0_i32, %c0_i32_0 : i32, i32, i32
  }
  func.func @transform_3(%arg0: i32) -> (i32, i32, i32) {
    %c0_i32 = arith.constant 0 : i32
    %c0_i32_0 = arith.constant 0 : i32
    %c0_i32_1 = arith.constant 0 : i32
    return %arg0, %c0_i32, %c0_i32_0 : i32, i32, i32
  }
  func.func @transform_4(%arg0: i32) -> (i32, i32, i32) {
    %c0_i32 = arith.constant 0 : i32
    %c0_i32_0 = arith.constant 0 : i32
    %c0_i32_1 = arith.constant 0 : i32
    return %arg0, %c0_i32, %c0_i32_0 : i32, i32, i32
  }
  func.func @transform_5(%arg0: i32) -> (i32, i32, i32) {
    %c0_i32 = arith.constant 0 : i32
    %c0_i32_0 = arith.constant 0 : i32
    %c0_i32_1 = arith.constant 0 : i32
    return %arg0, %c0_i32, %c0_i32_0 : i32, i32, i32
  }
  func.func @transform_6(%arg0: i32) -> (i32, i32, i32) {
    %c0_i32 = arith.constant 0 : i32
    %c0_i32_0 = arith.constant 0 : i32
    %c0_i32_1 = arith.constant 0 : i32
    return %arg0, %c0_i32, %c0_i32_0 : i32, i32, i32
  }
  func.func @transform_7(%arg0: i32) -> (i32, i32, i32) {
    %c0_i32 = arith.constant 0 : i32
    %c0_i32_0 = arith.constant 0 : i32
    %c0_i32_1 = arith.constant 0 : i32
    return %arg0, %c0_i32, %c0_i32_0 : i32, i32, i32
  }
  func.func @transform_8(%arg0: i32) -> (i32, i32, i32) {
    %c0_i32 = arith.constant 0 : i32
    %c0_i32_0 = arith.constant 0 : i32
    %c0_i32_1 = arith.constant 0 : i32
    return %arg0, %c0_i32, %c0_i32_0 : i32, i32, i32
  }
  func.func @transform_9(%arg0: i32) -> (i32, i32, i32) {
    %c0_i32 = arith.constant 0 : i32
    %c0_i32_0 = arith.constant 0 : i32
    %c0_i32_1 = arith.constant 0 : i32
    return %arg0, %c0_i32, %c0_i32_0 : i32, i32, i32
  }
  func.func @transform_10(%arg0: i32) -> (i32, i32, i32) {
    %c0_i32 = arith.constant 0 : i32
    %c0_i32_0 = arith.constant 0 : i32
    %c0_i32_1 = arith.constant 0 : i32
    return %arg0, %c0_i32, %c0_i32_0 : i32, i32, i32
  }
  func.func @transform_11(%arg0: i32) -> (i32, i32, i32) {
    %c0_i32 = arith.constant 0 : i32
    %c0_i32_0 = arith.constant 0 : i32
    %c0_i32_1 = arith.constant 0 : i32
    return %arg0, %c0_i32, %c0_i32_0 : i32, i32, i32
  }
  func.func @transform_12(%arg0: i32) -> (i32, i32) {
    %c0_i32 = arith.constant 0 : i32
    %c0_i32_0 = arith.constant 0 : i32
    %c0_i32_1 = arith.constant 0 : i32
    return %c0_i32, %c0_i32_0 : i32, i32
  }
  func.func @transform_13(%arg0: i32) -> (i32, i32) {
    %c0_i32 = arith.constant 0 : i32
    %c0_i32_0 = arith.constant 0 : i32
    %c0_i32_1 = arith.constant 0 : i32
    return %c0_i32, %c0_i32_0 : i32, i32
  }
  func.func @transform_14(%arg0: i32) -> (i32, i32) {
    %c0_i32 = arith.constant 0 : i32
    %c0_i32_0 = arith.constant 0 : i32
    %c0_i32_1 = arith.constant 0 : i32
    return %c0_i32, %c0_i32_0 : i32, i32
  }
}

</mosaic_0001>

<bundles_post_ra>
// kernel: tpu_custom_call.1
= control target key start
LH: loop header
LB: loop body
LE: loop exit
PB: predicated region body
PF: predicated region fallthrough
CT: control target
= control target key end

     0   :  { %s4801_s0 = inlined_call_operand.vmem [shape: f32[32,32], index: 0, kind: input, shape index: {}]   ;;  %s4802_s1 = inlined_call_operand.hbm [shape: f32[16,16], index: 1, kind: input, shape index: {}]   ;;  %s4803_s2 = inlined_call_operand.vmem [shape: f32[2,1,32], index: 2, kind: input, shape index: {}]   ;;  %s4804_s3 = inlined_call_operand.vmem [shape: f32[2,1,32], index: 3, kind: input, shape index: {}]   ;;  %s4805_s4 = inlined_call_operand.vmem [shape: bf16[2,32,96], index: 4, kind: input, shape index: {}]   ;;  %s4806_s5 = inlined_call_operand.vmem [shape: f32[2,1,96], index: 5, kind: input, shape index: {}]   ;;  %s4807_s6 = inlined_call_operand.vmem [shape: bf16[2,32,32], index: 6, kind: input, shape index: {}]   ;;  %s4808_s7 = inlined_call_operand.vmem [shape: f32[2,1,32], index: 7, kind: input, shape index: {}]   ;;  %s4809_s8 = inlined_call_operand.hbm [shape: f32[2,1,32], index: 8, kind: input, shape index: {}]   ;;  %s4810_s9 = inlined_call_operand.hbm [shape: f32[2,1,32], index: 9, kind: input, shape index: {}]   ;;  %s4811_s10 = inlined_call_operand.vmem [shape: bf16[2,32,256], index: 10, kind: input, shape index: {}]   ;;  %s4812_s11 = inlined_call_operand.vmem [shape: bf16[2,128,32], index: 11, kind: input, shape index: {}]   ;;  %s4813_s12 = inlined_call_operand.hbm [shape: f32[32,128], index: 12, kind: input, shape index: {}]   ;;  %s4814_s13 = inlined_call_operand.vmem [shape: f32[1,128], index: 13, kind: input, shape index: {}]   ;;  %s4815_s14 = inlined_call_operand.hbm [shape: f32[2,128], index: 14, kind: output, shape index: {}]  }
   0x1   :  { %4825 = sst [smem:[#allocation20_spill]] %s4801_s0 }
   0x2   :  { %4826 = sst [smem:[#allocation21_spill]] %s4802_s1 }
   0x3   :  { %4827 = sst [smem:[#allocation22_spill]] %s4809_s8 }
   0x4   :  { %4828 = sst [smem:[#allocation23_spill]] %s4811_s10 }
   0x5   :  { %4829 = sst [smem:[#allocation24_spill]] %s4812_s11 }
   0x6   :  { %4830 = sst [smem:[#allocation25_spill]] %s4814_s13 }
   0x7   :  { %4831 = sst [smem:[#allocation26_spill]] %s4815_s14 }
   0x8   :  { %19 = vsyncpa [#allocation5], 0 }
   0x9   :  { %20 = vsyncpa [#allocation8], 0 }
   0xa   :  { %22 = vsyncpa [#allocation8 + $0x1], 0 }
   0xb   :  { %23 = vsyncpa [#allocation11], 0 }
   0xc   :  { %24 = vsyncpa [#allocation6], 0  ;;  %s4208_s29 = smov 0   ;;  %s4210_s30 = smov 0  }
   0xd   :  { %s4212_s15 = smov 0   ;;  %s4214_s16 = smov 0  }
   0xe LB: > { %4832 = sst [smem:[#allocation17_spill]] %s4102_s15  ;;  %s4229_s17 = sadd.s32 1, %s4106_s16   ;;  %s4106_s16 = sphi %s4214_s16, %s4860_s16   ;;  %s4102_s15 = sphi %s4212_s15, %s4862_s15   ;;  %s4098_s30 = sphi %s4210_s30, %s4864_s30   ;;  %s4094_s29 = sphi %s4208_s29, %s4863_s29  }
   0xf   : > { %4833 = sst [smem:[#allocation18_spill]] %s4229_s17  ;;  %s235_s18 = sadd.s32 1, %s4102_s15 }
  0x10   : > { %s232_s19 = ssub.s32 %s4106_s16, %s4229_s17  ;;  %p242_p0 = scmp.ne.s32.totalorder %s4102_s15, %s4098_s30 }
  0x11   : > { %p233_p1 = scmp.eq.s32.totalorder %s232_s19, 0  ;;  %p243_p2 = scmp.eq.s32.totalorder %s4106_s16, 0 }
  0x12   : > { %p3660_p3 = scmp.lt.s32.totalorder %s4106_s16, 2  ;;  %s485_s21 = sand.u32 1, %s4106_s16  }
  0x13   : > { %s4239_s20 = scalar_select %p233_p1, %s4102_s15, %s235_s18  }
  0x14   : > { %p244_p4 = por %p243_p2, %p242_p0  ;;  %s4818_s22 = sand.u32 1, %s4102_s15  }
  0x15   : > { %4834 = sst [smem:[#allocation19_spill]] %s4239_s20  ;;  %s3191_s23 = sshll.u32 %s4106_s16, 4 }
  0x16   : > { %s4835_s8 = sld [smem:[#allocation22_spill]]  ;;  %s488_s27 = scalar_lea.vmem [#allocation7], %s4818_s22 }
  0x17   : > { %s495_s28 = sshll.u32 %s488_s27, 4  ;;  %p4253_p5 = pnand %p3660_p3, %p244_p4  ;;  %s4251_s28 = int_to_ptr.vmem [resolvable:$true] %s495_s28 }
  0x18   : > { %s4260_s24 = scalar_lea.hbm %s4810_s9, %s3191_s23  ;;  %s4262_s25 = scalar_lea.sflag [#allocation8], %s485_s21 }
  0x19   : > { %p4823_p7 = pneg %p4253_p5 }
  0x1c   : > { %s4247_s26 = scalar_lea.hbm %s4835_s8, %s3191_s23  ;;  %s3923_s14 = scalar_lea.hbm %s4835_s8, 32 }
  0x1d   : > { %s3918_s17 = scalar_lea.hbm %s4247_s26, 16  ;;  %p3924_p10 = scmp.lt.u32.totalorder %s4247_s26, %s4835_s8 }
  0x1e   : > { %p3919_p6 = scmp.ne.s32.totalorder %s4247_s26, %s3918_s17  ;;  %p3925_p11 = scmp.lt.u32.totalorder %s3923_s14, %s3918_s17 }
  0x1f   : > { %p3927_p13 = scmp.lt.u32.totalorder %s3918_s17, %s4247_s26 }
  0x20   : > { %p3921_p8 = pnand %p4823_p7, %p3919_p6  ;;  %p3926_p12 = por %p3925_p11, %p3924_p10 }
  0x22   : > { %p3922_p9 = pneg %p3921_p8  ;;  %p3928_p0 = por %p3927_p13, %p3926_p12 }
  0x24   : > { %p3929_p1 = pnand %p3928_p0, %p3922_p9 }
  0x26   : > { %3932 = shalt.err (!%p3929_p1)
}
  0x27   : > { %s3933_s21 = scalar_lea.vmem %s4251_s28, 16  ;;  %s4108_s22 = smov [#allocation7]  }
  0x28   : > { %p3934_p2 = scmp.ne.s32.totalorder %s4251_s28, %s3933_s21  ;;  %s3938_s23 = sshll.u32 %s4108_s22, 4  ;;  %s3939_s23 = int_to_ptr.vmem [resolvable:$false] %s3938_s23 }
  0x29   : > { %s3940_s13 = scalar_lea.vmem %s3939_s23, 32  ;;  %p3941_p6 = scmp.lt.s32.totalorder %s4251_s28, %s3939_s23 }
  0x2a   : > { %p3936_p3 = pnand %p3934_p2, %p4823_p7  ;;  %p3942_p8 = scmp.lt.s32.totalorder %s3940_s13, %s3933_s21 }
  0x2c   : > { %p3937_p4 = pneg %p3936_p3  ;;  %p3943_p10 = por %p3942_p8, %p3941_p6 }
  0x2e   : > { %p3944_p11 = pnand %p3943_p10, %p3937_p4 }
  0x30   : > { %3947 = shalt.err (!%p3944_p11)
}
  0x31   : > { %3654 = dma.hbm_to_vmem [thread:$0]  (!%p4253_p5), %s4247_s26, 16, %s4251_s28, %s4262_s25  }
  0x32   : > { %s4291_s14 = sadd.s32 4294967295, %s4106_s16   ;;  %p248_p9 = scmp.ne.s32.totalorder %s4098_s30, %s4094_s29 }
  0x33   : > { %p4822_p12 = scmp.eq.s32.totalorder %s4291_s14, 0  ;;  %p3187_p13 = scmp.ge.s32.totalorder %s4106_s16, 1 }
  0x34   : > { %p400_p0 = scmp.lt.s32.totalorder %s4106_s16, 3  ;;  %s4109_s26 = smov [#allocation4]  }
  0x35   : > { %p4300_p1 = por %p4822_p12, %p248_p9  ;;  %s415_s28 = sshll.u32 %s4109_s26, 4  ;;  %s4311_s28 = int_to_ptr.vmem [resolvable:$true] %s415_s28 }
  0x36   : > { %p4305_p3 = pnand %p3187_p13, %p400_p0  ;;  %s4110_s16 = smov [#allocation10]  }
  0x37   : > { %s4837_s17 = scalar_select %p4300_p1, 1, 0 }
  0x38   : > { %p3644_p4 = pneg %p4305_p3  ;;  %s428_s27 = sshll.u32 %s4110_s16, 4  ;;  %s4319_s27 = int_to_ptr.vmem [resolvable:$true] %s428_s27 }
  0x39   : > { %s4840_s20 = sand.u32 1, %s4102_s15   ;;  %s4841_s1 = sld [smem:[#allocation21_spill]] }
  0x3a   : > { %p4315_p6 = pnand %p3644_p4, %p4822_p12  ;;  %s505_s21 = scalar_lea.vmem [#allocation9], %s4840_s20 }
  0x3b   : > { %s512_s22 = sshll.u32 %s505_s21, 4  ;;  %s4323_s22 = int_to_ptr.vmem [resolvable:$true] %s512_s22 }
  0x3c   : > { %p3950_p10 = pneg %p4315_p6 }
  0x3f   : > { %s3948_s26 = scalar_lea.hbm %s4841_s1, 256 }
  0x40   : > { %p3949_p8 = scmp.ne.s32.totalorder %s4841_s1, %s3948_s26  ;;  %p3955_p13 = scmp.lt.u32.totalorder %s3948_s26, %s4841_s1 }
  0x42   : > { %p3951_p11 = pnand %p3950_p10, %p3949_p8 }
  0x44   : > { %p3952_p9 = pneg %p3951_p11 }
  0x46   : > { %p3957_p0 = pnand %p3955_p13, %p3952_p9 }
  0x48   : > { %3960 = shalt.err (!%p3957_p0)
}
  0x49   : > { %s3961_s20 = scalar_lea.vmem %s4311_s28, 256  ;;  %p3969_p7 = scmp.lt.s32.totalorder %s4311_s28, %s4311_s28 }
  0x4a   : > { %p3962_p4 = scmp.ne.s32.totalorder %s4311_s28, %s3961_s20  ;;  %p3970_p8 = scmp.lt.s32.totalorder %s3961_s20, %s3961_s20 }
  0x4c   : > { %p3964_p2 = pnand %p3962_p4, %p3950_p10  ;;  %p3971_p11 = por %p3970_p8, %p3969_p7 }
  0x4e   : > { %p3965_p12 = pneg %p3964_p2 }
  0x50   : > { %p3972_p1 = pnand %p3971_p11, %p3965_p12 }
  0x52   : > { %3975 = shalt.err (!%p3972_p1)
}
  0x53   : > { %s4111_s0 = smov 128   ;;  %s4112_s8 = smov 8  }
  0x54   : > { %3647 = dma.hbm_to_vmem [thread:$0]  (!%p4315_p6), %s4841_s1, 256, %s4311_s28, [#allocation5], %s4111_s0, %s4111_s0, %s4112_s8  }
  0x55   : > { %s3976_s26 = scalar_lea.hbm %s4813_s12, 512 }
  0x56   : > { %p3977_p7 = scmp.ne.s32.totalorder %s4813_s12, %s3976_s26  ;;  %p3983_p2 = scmp.lt.u32.totalorder %s3976_s26, %s4813_s12 }
  0x58   : > { %p3979_p12 = pnand %p3977_p7, %p3950_p10 }
  0x5a   : > { %p3980_p1 = pneg %p3979_p12 }
  0x5c   : > { %p3985_p9 = pnand %p3983_p2, %p3980_p1 }
  0x5e   : > { %3988 = shalt.err (!%p3985_p9)
}
  0x5f   : > { %s3989_s28 = scalar_lea.vmem %s4319_s27, 512  ;;  %p3997_p8 = scmp.lt.s32.totalorder %s4319_s27, %s4319_s27 }
  0x60   : > { %p3990_p13 = scmp.ne.s32.totalorder %s4319_s27, %s3989_s28  ;;  %p3998_p11 = scmp.lt.s32.totalorder %s3989_s28, %s3989_s28 }
  0x62   : > { %p3992_p0 = pnand %p3990_p13, %p3950_p10  ;;  %p3999_p7 = por %p3998_p11, %p3997_p8 }
  0x64   : > { %p3993_p4 = pneg %p3992_p0 }
  0x66   : > { %p4000_p12 = pnand %p3999_p7, %p3993_p4 }
  0x68   : > { %4003 = shalt.err (!%p4000_p12)
}
  0x69   : > { %3650 = dma.hbm_to_vmem [thread:$0]  (!%p4315_p6), %s4813_s12, 512, %s4319_s27, [#allocation11], %s4111_s0, %s4111_s0, %s4112_s8  }
  0x6a   : > { %s4004_s15 = scalar_lea.hbm %s4260_s24, 16  ;;  %p4842_p1 = pneg %p4253_p5 }
  0x6b   : > { %p4005_p10 = scmp.ne.s32.totalorder %s4260_s24, %s4004_s15  ;;  %s4009_s29 = scalar_lea.hbm %s4810_s9, 32 }
  0x6c   : > { %p4010_p13 = scmp.lt.u32.totalorder %s4260_s24, %s4810_s9  ;;  %p4011_p0 = scmp.lt.u32.totalorder %s4009_s29, %s4004_s15 }
  0x6d   : > { %p4007_p2 = pnand %p4005_p10, %p4842_p1  ;;  %p4013_p8 = scmp.lt.u32.totalorder %s4004_s15, %s4260_s24 }
  0x6e   : > { %p4012_p4 = por %p4011_p0, %p4010_p13 }
  0x6f   : > { %p4008_p9 = pneg %p4007_p2 }
  0x70   : > { %p4014_p11 = por %p4013_p8, %p4012_p4 }
  0x72   : > { %p4015_p7 = pnand %p4014_p11, %p4008_p9 }
  0x74   : > { %4018 = shalt.err (!%p4015_p7)
}
  0x75   : > { %s4019_s27 = scalar_lea.vmem %s4323_s22, 16  ;;  %p4843_p12 = pmov %p4842_p1 }
  0x76   : > { %p4020_p6 = scmp.ne.s32.totalorder %s4323_s22, %s4019_s27  ;;  %s4113_s0 = smov [#allocation9]  }
  0x77   : > { %s4024_s8 = sshll.u32 %s4113_s0, 4  ;;  %s4025_s8 = int_to_ptr.vmem [resolvable:$false] %s4024_s8 }
  0x78   : > { %p4022_p10 = pnand %p4020_p6, %p4843_p12  ;;  %s4026_s16 = scalar_lea.vmem %s4025_s8, 32 }
  0x79   : > { %p4027_p2 = scmp.lt.s32.totalorder %s4323_s22, %s4025_s8  ;;  %p4028_p13 = scmp.lt.s32.totalorder %s4026_s16, %s4019_s27 }
  0x7a   : > { %p4023_p1 = pneg %p4022_p10 }
  0x7b   : > { %p4029_p0 = por %p4028_p13, %p4027_p2 }
  0x7d   : > { %p4030_p4 = pnand %p4029_p0, %p4023_p1 }
  0x7f   : > { %4033 = shalt.err (!%p4030_p4)
}
  0x80   : > { %3657 = dma.hbm_to_vmem [thread:$0]  (!%p4253_p5), %s4260_s24, 16, %s4323_s22, %s4262_s25  }
  0x81   : > { %537 = sbr.rel (%p4305_p3) target bundleno = 4683 (0x124b), region = 76  ;;  %p4844_p9 = scmp.eq.s32.totalorder (!%p4305_p3), %s4291_s14, 0 }
  0x88   : > { %4077 = dma.done.wait (%p4844_p9), [#allocation5], 256   ;;  %p4845_p8 = pmov %p4844_p9 }
  0x89   : > { %s543_s20 = sand.u32 1, %s4291_s14   ;;  %s545_s28 = sand.u32 1, %s4098_s30  }
  0x8a   : > { %4079 = vsyncadd (%p4845_p8), [#allocation5], 4294967040  ;;  %s544_s10 = scalar_lea.sflag [#allocation8], %s543_s20  ;;  %s4409_s18 = scalar_lea.vmem [#allocation7], %s545_s28 }
  0x8b   : > { %p4846_p11 = scmp.ne.s32.totalorder %s4837_s17, 0 }
  0x8d   : > { %4081 = dma.done.wait (%p4846_p11), %s544_s10, 32  }
  0x8e   : > { %4083 = vsyncadd (%p4846_p11), %s544_s10, 4294967264  ;;  %s4415_s24 = scalar_lea.vmem [#allocation9], %s545_s28  ;;  %p4847_p5 = pmov %p4845_p8 }
  0x90   : > { %4085 = dma.done.wait (%p4847_p5), [#allocation11], 512   ;;  %p4848_p3 = pmov %p4847_p5 }
  0x91   : > { %p633_p7 = scmp.lt.s32.totalorder %s4291_s14, 1  ;;  %s4849_s17 = sld [smem:[#allocation23_spill]] }
  0x92   : > { %4087 = vsyncadd (%p4848_p3), [#allocation11], 4294966784  ;;  %s4850_s0 = sld [smem:[#allocation24_spill]]  ;;  %p4851_p6 = scmp.ne.s32.totalorder %s4291_s14, 0 }
  0x93   : > { %s4423_s25 = scalar_select %p633_p7, %s4291_s14, 1 }
  0x94   : > { %669 = sbr.rel (%p4851_p6) target bundleno = 157 (0x9d), region = 96  ;;  %s4852_s20 = sld [smem:[#allocation20_spill]] (!%p4851_p6)  ;;  %vm674_vm0 = vcmask (!%p4851_p6), 261120  }
  0x95   : > { %s3292_s23 = sshll.u32 %s4423_s25, 4  ;;  %s654_s22 = scalar_lea.vmem %s4808_s7, %s4423_s25 }
  0x96   : > { %s4441_s8 = scalar_lea.vmem %s4805_s4, %s3292_s23  ;;  %s4446_s28 = scalar_lea.vmem %s4807_s6, %s3292_s23 }
  0x97   : > { %s3294_s11 = sshll.u32 %s4423_s25, 5  ;;  %s3295_s13 = sshll.u32 %s4423_s25, 6 }
  0x98   : > { %s4456_s29 = scalar_lea.vmem %s4849_s17, %s3294_s11  ;;  %s4462_s1 = scalar_lea.vmem %s4850_s0, %s3295_s13 }
  0x9a   : > { %v670_v0 = vld [vmem:[%s4852_s20] sm:$0xff] (!%p4851_p6)  ;;  %v671_v1 = vld [vmem:[%s4852_s20 + $0x8] sm:$0xff] (!%p4851_p6)  ;;  %v672_v2 = vld [vmem:[%s4852_s20 + $0x10] sm:$0xff] (!%p4851_p6) }
  0x9b   : > { %675 = vst.msk [vmem:[#allocation2] sm:$0xff] %vm674_vm0, %v670_v0  ;;  %676 = vst.msk [vmem:[#allocation2 + $0x8] sm:$0xff] %vm674_vm0, %v671_v1  ;;  %v673_v3 = vld [vmem:[%s4852_s20 + $0x18] sm:$0xff] }
  0x9c   : > { %677 = vst.msk [vmem:[#allocation2 + $0x10] sm:$0xff] %vm674_vm0, %v672_v2  ;;  %678 = vst.msk [vmem:[#allocation2 + $0x18] sm:$0xff] %vm674_vm0, %v673_v3 }
  0x9d PF: > { %vm687_vm1 = vcmask 261120   ;;  %v3800_v32 = vld [vmem:[%s4441_s8] sm:$0xff]   ;;  %v3801_v33 = vld [vmem:[%s4441_s8 + $0x8] sm:$0xff]   ;;  %s4853_s13 = scalar_lea.vmem %s4803_s2, %s4423_s25  ;;  %s4854_s23 = scalar_lea.vmem %s4804_s3, %s4423_s25  ;;  %vm847_vm2 = vcmask 64512   ;;  %vm1020_vm4 = vcmask 130048   ;;  %vm1659_vm5 = vcmask 130112  }
  0x9e   : > { %3383 = vmatprep.subr.bf16.mxu1 %v3800_v32  ;;  %v3205_v48 = vld [vmem:[%s4853_s13] ss:$0 sm:$0xff]  ;;  %s4855_s19 = scalar_lea.vmem %s4806_s5, %s4423_s25  ;;  %s4114_s17 = smov 96   ;;  %vm4529_vm3 = vmpackc.low %vm847_vm2, %vm847_vm2  ;;  %vm2080_vm6 = vcmask 195712   ;;  %vm2501_vm7 = vcmask 261312  }
  0x9f   : > { %3384 = vmatpush3.bf16.msra.mxu1 %v3800_v32  ;;  %v3206_v54 = vld [vmem:[%s4854_s23] ss:$0 sm:$0xff]  ;;  %s4115_s21 = smov 64   ;;  %s4116_s26 = smov 88  }
  0xa0   : > { %3385 = vmatprep.subr.bf16.mxu1 %v3801_v33  ;;  %v3207_v2 = vld [vmem:[%s4855_s19] ss:$0 sm:$0xff]  ;;  %s4117_s11 = smov 120   ;;  %s4118_s8 = smov 56  }
  0xa1   : > { %s4119_s15 = smov 80   ;;  %s4120_s13 = smov 112  }
  0xa2   : > { %s4121_s27 = smov 48   ;;  %s4122_s0 = smov 72  }
  0xa3   : > { %v681_v5 = vld [vmem:[#allocation2 + $0x10] sm:$0xff]  ;;  %v682_v10 = vld [vmem:[#allocation2 + $0x18] sm:$0xff]  ;;  %3386 = vmatpush3.bf16.msra.mxu1 %v3801_v33  ;;  %s4123_s23 = smov 104   ;;  %s4124_s16 = smov 40  }
  0xa4   : > { %v679_v4 = vld [vmem:[#allocation2] sm:$0xff]  ;;  %v680_v6 = vld [vmem:[#allocation2 + $0x8] sm:$0xff]  ;;  %v694_v8 = vsel %vm687_vm1, %v681_v5, 0.0  ;;  %v697_v11 = vsel %vm687_vm1, %v682_v10, 0.0  ;;  %s4125_s10 = smov 8   ;;  %s4126_s19 = smov 16  }
  0xa5   : > { %v688_v7 = vsel %vm687_vm1, %v679_v4, 0.0  ;;  %v691_v9 = vsel %vm687_vm1, %v680_v6, 0.0  ;;  %695 = vadd.xlane.f32.xlu1 %v694_v8  ;;  %p3285_p12 = scmp.ne.s32.totalorder %s4291_s14, 1 }
  0xa6   : > { %689 = vadd.xlane.f32.xlu0 %v688_v7  ;;  %vm4130_vm8 = vmmov (!%p3285_p12), 0   ;;  %vm2922_vm9 = vcmask (!%p3285_p12), 1040384  }
  0xa9   : > { %698 = vadd.xlane.f32.xlu1 %v697_v11 }
  0xaa   : > { %692 = vadd.xlane.f32.xlu0 %v691_v9 }
 0x132   : > { %v696_v13 = vpop.xlane.xlu1 %695 }
 0x133   : > { %v690_v12 = vpop.xlane.xlu0 %689  ;;  %v703_v15 = vmul.f32 0.03125, %v696_v13 }
 0x134   : > { %v701_v14 = vmul.f32 0.03125, %v690_v12 }
 0x135   : > { %v707_v17 = vsub.f32 %v681_v5, %v703_v15 }
 0x136   : > { %v705_v16 = vsub.f32 %v679_v4, %v701_v14  ;;  %v699_v19 = vpop.xlane.xlu1 %698 }
 0x137   : > { %v693_v18 = vpop.xlane.xlu0 %692  ;;  %v704_v21 = vmul.f32 0.03125, %v699_v19  ;;  %v711_v23 = vmul.f32 %v707_v17, %v707_v17 }
 0x138   : > { %v702_v20 = vmul.f32 0.03125, %v693_v18  ;;  %v709_v22 = vmul.f32 %v705_v16, %v705_v16 }
 0x139   : > { %v708_v25 = vsub.f32 %v682_v10, %v704_v21  ;;  %v719_v27 = vsel %vm687_vm1, %v711_v23, 0.0 }
 0x13a   : > { %v706_v24 = vsub.f32 %v680_v6, %v702_v20  ;;  %v713_v26 = vsel %vm687_vm1, %v709_v22, 0.0  ;;  %v4545_v22 = vld [vmem:[#allocation4 + $0x8] sm:$0xff] }
 0x13b   : > { %714 = vadd.xlane.f32.xlu0 %v713_v26  ;;  %v712_v29 = vmul.f32 %v708_v25, %v708_v25 }
 0x13c   : > { %v710_v28 = vmul.f32 %v706_v24, %v706_v24 }
 0x13d   : > { %v722_v31 = vsel %vm687_vm1, %v712_v29, 0.0 }
 0x13e   : > { %v716_v30 = vsel %vm687_vm1, %v710_v28, 0.0 }
 0x13f   : > { %720 = vadd.xlane.f32.xlu0 %v719_v27  ;;  %717 = vadd.xlane.f32.xlu1 %v716_v30 }
 0x143   : > { %723 = vadd.xlane.f32.xlu1 %v722_v31 }
 0x1c8   : > { %v715_v34 = vpop.xlane.xlu0 %714 }
 0x1c9   : > { %v725_v35 = vmul.f32 0.03125, %v715_v34 }
 0x1cb   : > { %v729_v36 = vadd.f32 1e-05, %v725_v35 }
 0x1cc   : > { %v718_v37 = vpop.xlane.xlu1 %717  ;;  %v721_v38 = vpop.xlane.xlu0 %720 }
 0x1cd   : > { %3818 = vrsqrt.f32 %v729_v36  ;;  %v726_v39 = vmul.f32 0.03125, %v718_v37  ;;  %v727_v40 = vmul.f32 0.03125, %v721_v38 }
 0x1cf   : > { %v730_v41 = vadd.f32 1e-05, %v726_v39  ;;  %v731_v42 = vadd.f32 1e-05, %v727_v40 }
 0x1d0   : > { %v724_v43 = vpop.xlane.xlu1 %723 }
 0x1d1   : > { %3820 = vrsqrt.f32 %v730_v41  ;;  %v728_v44 = vmul.f32 0.03125, %v724_v43 }
 0x1d2   : > { %3822 = vrsqrt.f32 %v731_v42 }
 0x1d3   : > { %v732_v45 = vadd.f32 1e-05, %v728_v44 }
 0x1d5   : > { %3824 = vrsqrt.f32 %v732_v45 }
 0x1d7   : > { %v3819_v46 = vpop.eup %3818 }
 0x1d8   : > { %v737_v47 = vmul.f32 %v3819_v46, %v705_v16 }
 0x1da   : > { %v747_v52 = vmul.f32 %v3205_v48, %v737_v47 }
 0x1db   : > { %v3821_v49 = vpop.eup %3820 }
 0x1dc   : > { %v3823_v50 = vpop.eup %3822  ;;  %v738_v51 = vmul.f32 %v3821_v49, %v706_v24  ;;  %v757_v58 = vadd.f32 %v3206_v54, %v747_v52  ;;  %v4547_v24 = vld [vmem:[#allocation4] sm:$0xff] }
 0x1dd   : > { %v739_v53 = vmul.f32 %v3823_v50, %v707_v17 }
 0x1de   : > { %v748_v55 = vmul.f32 %v3205_v48, %v738_v51 }
 0x1df   : > { %v3825_v56 = vpop.eup %3824  ;;  %v749_v60 = vmul.f32 %v3205_v48, %v739_v53 }
 0x1e0   : > { %v740_v57 = vmul.f32 %v3825_v56, %v708_v25  ;;  %v758_v59 = vadd.f32 %v3206_v54, %v748_v55 }
 0x1e1   : > { %v759_v63 = vadd.f32 %v3206_v54, %v749_v60 }
 0x1e2   : > { %v761_v61 = vpack.c.bf16 %v758_v59, %v757_v58  ;;  %v750_v62 = vmul.f32 %v3205_v48, %v740_v57 }
 0x1e4   : > { %3387 = vmatprep.mubr.msk.bf16.mxu1 %vm687_vm1, %v761_v61  ;;  %v760_v0 = vadd.f32 %v3206_v54, %v750_v62 }
 0x1e6   : > { %v762_v1 = vpack.c.bf16 %v760_v0, %v759_v63 }
 0x1e8   : > { %3388 = vmatmul.mubr.msk.bf16.vlgmr.msra.gmra.mrb[0].mxu1 %vm687_vm1, %v762_v1 }
 0x2bb   : > { %v3389_v3 = vpop.f32.mrb[0].mxu1 }
 0x2bc   : > { %v4505_v4 = vadd.f32 %v3389_v3, %v3207_v2  ;;  %v826_v5 = vpop.f32.mrb[1].mxu1 }
 0x2bd   : > { %v4507_v6 = vadd.f32 %v3207_v2, %v826_v5  ;;  %v3390_v7 = vpop.f32.mrb[2].mxu1 }
 0x2be   : > { %v4509_v8 = vadd.f32 %v3390_v7, %v3207_v2  ;;  %v829_v9 = vpop.f32.mrb[3].mxu1  ;;  %3402 = vmatprep.mubr.msk.f32.mxu0 %vm847_vm2, %v4505_v4 }
 0x2bf   : > { %v4513_v10 = vadd.f32 %v3207_v2, %v829_v9  ;;  %3395 = vmatprep.mubr.msk.f32.mxu1 %vm847_vm2, %v4507_v6 }
 0x2c0   : > { %v4519_v11 = vpack.i.bf16 %v4509_v8, %v4505_v4 }
 0x2c1   : > { %v4523_v12 = vpack.i.bf16 %v4513_v10, %v4507_v6 }
 0x2c2   : > { %3726 = vrot.lane.b32.xlu1 %v4519_v11, %s4114_s17 }
 0x2c3   : > { %3721 = vrot.lane.b32.xlu0 %v4523_v12, %s4114_s17  ;;  %s4127_s17 = smov 24  }
 0x334   : > { %v3727_v13 = vpop.permute.xlu1 %3726 }
 0x335   : > { %v3729_v14 = vunpack.i.h.bf16 %v3727_v13  ;;  %v3728_v15 = vunpack.i.l.bf16 %v3727_v13  ;;  %v3722_v16 = vpop.permute.xlu0 %3721 }
 0x336   : > { %v3724_v17 = vunpack.i.h.bf16 %v3722_v16  ;;  %v3723_v18 = vunpack.i.l.bf16 %v3722_v16 }
 0x337   : > { %v3548_v20 = vpack.c.bf16 %v3729_v14, %v3728_v15 }
 0x338   : > { %v3542_v21 = vpack.c.bf16 %v3724_v17, %v3723_v18 }
 0x339   : > { %3550 = vmatprep.subr.msk.bf16.mxu0 %vm4529_vm3, %v3548_v20 }
 0x33a   : > { %3544 = vmatprep.subr.msk.bf16.mxu1 %vm4529_vm3, %v3542_v21  ;;  %3553 = vmatpush3.bf16.xpose.msk.msra.mxu0 %vm4529_vm3, %v3548_v20 }
 0x33b   : > { %3547 = vmatpush3.bf16.xpose.msk.msra.mxu1 %vm4529_vm3, %v3542_v21 }
 0x341   : > { %3403 = vmatmul.mubr.msk.f32.vlgmr.msra.gmra.mrb[0].mxu0 %vm847_vm2, %v4509_v8 }
 0x342   : > { %3396 = vmatmul.mubr.msk.f32.vlgmr.msra.gmra.mrb[4].mxu1 %vm847_vm2, %v4513_v10 }
 0x414   : > { %v3404_v23 = vpop.f32.mrb[0].mxu0 }
 0x415   : > { %v3397_v25 = vpop.f32.mrb[4].mxu1  ;;  %v1011_v26 = vpop.f32.mrb[1].mxu0  ;;  %v1017_v32 = vadd.f32 %v3404_v23, %v4545_v22 }
 0x416   : > { %v928_v27 = vadd.f32 %v3397_v25, %v4545_v22  ;;  %v922_v28 = vpop.f32.mrb[5].mxu1  ;;  %v1012_v30 = vadd.f32 %v1011_v26, %v4547_v24 }
 0x417   : > { %v923_v29 = vadd.f32 %v922_v28, %v4547_v24  ;;  %v1030_v35 = vsel %vm1020_vm4, %v1017_v32, -inf }
 0x418   : > { %v1024_v31 = vsel %vm1020_vm4, %v928_v27, -inf  ;;  %v1027_v34 = vsel %vm1020_vm4, %v1012_v30, -inf }
 0x419   : > { %1025 = vmax.xlane.f32.xlu0 %v1024_v31  ;;  %v1021_v33 = vsel %vm1020_vm4, %v923_v29, -inf }
 0x41a   : > { %1022 = vmax.xlane.f32.xlu1 %v1021_v33 }
 0x41d   : > { %1028 = vmax.xlane.f32.xlu0 %v1027_v34 }
 0x41e   : > { %1031 = vmax.xlane.f32.xlu1 %v1030_v35 }
 0x4a6   : > { %v1026_v36 = vpop.xlane.xlu0 %1025 }
 0x4a7   : > { %v1023_v37 = vpop.xlane.xlu1 %1022  ;;  %v1034_v39 = vsub.f32 %v928_v27, %v1026_v36 }
 0x4a8   : > { %v1033_v38 = vsub.f32 %v923_v29, %v1023_v37 }
 0x4a9   : > { %v1039_v46 = vmul.f32 1.442695, %v1034_v39 }
 0x4aa   : > { %v1029_v40 = vpop.xlane.xlu0 %1028  ;;  %v1037_v44 = vmul.f32 1.442695, %v1033_v38 }
 0x4ab   : > { %v1035_v41 = vsub.f32 %v1012_v30, %v1029_v40  ;;  %v1032_v42 = vpop.xlane.xlu1 %1031 }
 0x4ac   : > { %v1036_v43 = vsub.f32 %v1017_v32, %v1032_v42 }
 0x4ad   : > { %v1041_v45 = vmul.f32 1.442695, %v1035_v41 }
 0x4ae   : > { %v1043_v47 = vmul.f32 1.442695, %v1036_v43 }
 0x4af   : > { %3826 = vpow2.f32 %v1041_v45 }
 0x4b0   : > { %3828 = vpow2.f32 %v1043_v47 }
 0x4b1   : > { %3830 = vpow2.f32 %v1037_v44 }
 0x4b2   : > { %3832 = vpow2.f32 %v1039_v46 }
 0x4b9   : > { %v3827_v48 = vpop.eup %3826 }
 0x4ba   : > { %v4557_v49 = vpop.eup %3828  ;;  %v1051_v50 = vsel %vm1020_vm4, %v3827_v48, 0.0 }
 0x4bb   : > { %v3831_v51 = vpop.eup %3830  ;;  %1052 = vadd.xlane.f32.xlu0 %v1051_v50  ;;  %v1054_v52 = vsel %vm1020_vm4, %v4557_v49, 0.0 }
 0x4bc   : > { %v3833_v53 = vpop.eup %3832  ;;  %1055 = vadd.xlane.f32.xlu1 %v1054_v52  ;;  %v1045_v54 = vsel %vm1020_vm4, %v3831_v51, 0.0 }
 0x4bd   : > { %v1048_v55 = vsel %vm1020_vm4, %v3833_v53, 0.0 }
 0x4bf   : > { %1046 = vadd.xlane.f32.xlu0 %v1045_v54 }
 0x4c0   : > { %1049 = vadd.xlane.f32.xlu1 %v1048_v55 }
 0x4d1   : > { %3736 = vrot.lane.b32.xlu1 %v4519_v11, %s4115_s21 }
 0x4d5   : > { %3731 = vrot.lane.b32.xlu0 %v4523_v12, %s4115_s21  ;;  %3741 = vrot.lane.b32.xlu1 %v4523_v12, %s4116_s26 }
 0x4d9   : > { %3746 = vrot.lane.b32.xlu0 %v4519_v11, %s4116_s26  ;;  %1243 = vrot.lane.b32.xlu1 %v4507_v6, %s4117_s11 }
 0x4dd   : > { %1334 = vrot.lane.b32.xlu0 %v4505_v4, %s4117_s11  ;;  %1245 = vrot.lane.b32.xlu1 %v4513_v10, %s4117_s11 }
 0x4e1   : > { %1336 = vrot.lane.b32.xlu1 %v4509_v8, %s4117_s11 }
 0x548   : > { %v1053_v56 = vpop.xlane.xlu0 %1052 }
 0x549   : > { %v1056_v57 = vpop.xlane.xlu1 %1055  ;;  %3834 = vrcp.f32 %v1053_v56 }
 0x54c   : > { %v1047_v58 = vpop.xlane.xlu0 %1046 }
 0x54d   : > { %3836 = vrcp.f32 %v1047_v58  ;;  %v1050_v59 = vpop.xlane.xlu1 %1049 }
 0x54e   : > { %3838 = vrcp.f32 %v1050_v59 }
 0x54f   : > { %3840 = vrcp.f32 %v1056_v57 }
 0x550   : > { %v3732_v60 = vpop.permute.xlu0 %3731 }
 0x551   : > { %v3734_v61 = vunpack.i.h.bf16 %v3732_v60  ;;  %v3733_v62 = vunpack.i.l.bf16 %v3732_v60  ;;  %v3737_v63 = vpop.permute.xlu1 %3736 }
 0x552   : > { %v3739_v0 = vunpack.i.h.bf16 %v3737_v63  ;;  %v3738_v1 = vunpack.i.l.bf16 %v3737_v63 }
 0x553   : > { %v3554_v2 = vpack.c.bf16 %v3734_v61, %v3733_v62  ;;  %v3835_v9 = vpop.eup %3834 }
 0x554   : > { %v3558_v3 = vpack.c.bf16 %v3739_v0, %v3738_v1  ;;  %v3747_v5 = vpop.permute.xlu0 %3746  ;;  %v1062_v28 = vmul.f32 %v3835_v9, %v3827_v48 }
 0x555   : > { %3555 = vmatprep.subr.bf16.mxu1 %v3554_v2  ;;  %v3742_v7 = vpop.permute.xlu1 %3741  ;;  %v3749_v16 = vunpack.i.h.bf16 %v3747_v5  ;;  %v3748_v17 = vunpack.i.l.bf16 %v3747_v5 }
 0x556   : > { %v3744_v13 = vunpack.i.h.bf16 %v3742_v7  ;;  %v3743_v14 = vunpack.i.l.bf16 %v3742_v7  ;;  %3557 = vmatpush3.bf16.msra.mxu1 %v3554_v2 }
 0x557   : > { %v3837_v15 = vpop.eup %3836  ;;  %3559 = vmatprep.subr.bf16.mxu1 %v3558_v3  ;;  %v3568_v27 = vpack.c.bf16 %v3749_v16, %v3748_v17 }
 0x558   : > { %v3839_v18 = vpop.eup %3838  ;;  %v3562_v20 = vpack.c.bf16 %v3744_v13, %v3743_v14  ;;  %v1058_v21 = vmul.f32 %v3837_v15, %v3831_v51  ;;  %v1335_v30 = vpop.permute.xlu0 %1334 }
 0x559   : > { %v1060_v23 = vmul.f32 %v3839_v18, %v3833_v53  ;;  %v1244_v25 = vpop.permute.xlu1 %1243  ;;  %v3841_v26 = vpop.eup %3840 }
 0x55a   : > { %3409 = vmatprep.mubr.msk.f32.mxu1 %vm1020_vm4, %v1058_v21  ;;  %3564 = vmatprep.subr.msk.bf16.mxu0 %vm4529_vm3, %v3562_v20  ;;  %v1064_v29 = vmul.f32 %v3841_v26, %v4557_v49 }
 0x55b   : > { %3423 = vmatprep.mubr.msk.f32.mxu0 %vm847_vm2, %v1244_v25  ;;  %3410 = vmatmul.mubr.msk.f32.vlgmr.msra.gmra.mrb[6].mxu1 %vm1020_vm4, %v1060_v23 }
 0x55c   : > { %3561 = vmatpush3.bf16.msra.mxu1 %v3558_v3  ;;  %3567 = vmatpush3.bf16.xpose.msk.msra.mxu0 %vm4529_vm3, %v3562_v20 }
 0x55d   : > { %3416 = vmatprep.mubr.msk.f32.mxu1 %vm1020_vm4, %v1062_v28  ;;  %3570 = vmatprep.subr.msk.bf16.mxu1 %vm4529_vm3, %v3568_v27  ;;  %v1246_v31 = vpop.permute.xlu1 %1245 }
 0x55f   : > { %3417 = vmatmul.mubr.msk.f32.vlgmr.msra.gmra.mrb[8].mxu1 %vm1020_vm4, %v1064_v29 }
 0x560   : > { %3430 = vmatprep.mubr.msk.f32.mxu1 %vm847_vm2, %v1335_v30 }
 0x561   : > { %v1337_v32 = vpop.permute.xlu1 %1336 }
 0x563   : > { %3424 = vmatmul.mubr.msk.f32.vlgmr.msra.gmra.mrb[2].mxu0 %vm847_vm2, %v1246_v31 }
 0x565   : > { %3573 = vmatpush3.bf16.xpose.msk.msra.mxu1 %vm4529_vm3, %v3568_v27 }
 0x56c   : > { %3431 = vmatmul.mubr.msk.f32.vlgmr.msra.gmra.mrb[10].mxu1 %vm847_vm2, %v1337_v32 }
 0x62e   : > { %v3411_v33 = vpop.f32.mrb[6].mxu1 }
 0x62f   : > { %1240 = vst.msk [vmem:[#allocation3 + $0x8] sm:$0xff] %vm847_vm2, %v3411_v33  ;;  %v1143_v34 = vpop.f32.mrb[7].mxu1 }
 0x630   : > { %1239 = vst.msk [vmem:[#allocation3] sm:$0xff] %vm847_vm2, %v1143_v34 }
 0x632   : > { %v3418_v35 = vpop.f32.mrb[8].mxu1 }
 0x633   : > { %1242 = vst.msk [vmem:[#allocation3 + $0x18] sm:$0xff] %vm847_vm2, %v3418_v35  ;;  %v1230_v36 = vpop.f32.mrb[9].mxu1 }
 0x634   : > { %1241 = vst.msk [vmem:[#allocation3 + $0x10] sm:$0xff] %vm847_vm2, %v1230_v36 }
 0x636   : > { %v3425_v37 = vpop.f32.mrb[2].mxu0 }
 0x637   : > { %v1331_v38 = vadd.f32 %v3425_v37, %v4545_v22  ;;  %v1325_v39 = vpop.f32.mrb[3].mxu0 }
 0x638   : > { %v1326_v40 = vadd.f32 %v1325_v39, %v4547_v24 }
 0x639   : > { %v1428_v41 = vsel %vm1020_vm4, %v1331_v38, -inf }
 0x63a   : > { %1429 = vmax.xlane.f32.xlu1 %v1428_v41  ;;  %v1425_v42 = vsel %vm1020_vm4, %v1326_v40, -inf }
 0x63b   : > { %1426 = vmax.xlane.f32.xlu0 %v1425_v42 }
 0x63f   : > { %v3432_v43 = vpop.f32.mrb[10].mxu1 }
 0x640   : > { %v1416_v44 = vpop.f32.mrb[11].mxu1  ;;  %v1422_v46 = vadd.f32 %v3432_v43, %v4545_v22 }
 0x641   : > { %v1417_v45 = vadd.f32 %v1416_v44, %v4547_v24 }
 0x642   : > { %v1434_v48 = vsel %vm1020_vm4, %v1422_v46, -inf }
 0x643   : > { %v1431_v47 = vsel %vm1020_vm4, %v1417_v45, -inf }
 0x644   : > { %1432 = vmax.xlane.f32.xlu0 %v1431_v47 }
 0x648   : > { %1435 = vmax.xlane.f32.xlu0 %v1434_v48 }
 0x6c7   : > { %v1430_v49 = vpop.xlane.xlu1 %1429 }
 0x6c8   : > { %v1438_v50 = vsub.f32 %v1331_v38, %v1430_v49  ;;  %v1427_v51 = vpop.xlane.xlu0 %1426 }
 0x6c9   : > { %v1437_v52 = vsub.f32 %v1326_v40, %v1427_v51 }
 0x6ca   : > { %v1443_v53 = vmul.f32 1.442695, %v1438_v50 }
 0x6cb   : > { %v1441_v54 = vmul.f32 1.442695, %v1437_v52 }
 0x6cc   : > { %3842 = vpow2.f32 %v1443_v53 }
 0x6cd   : > { %3844 = vpow2.f32 %v1441_v54 }
 0x6d1   : > { %v1433_v59 = vpop.xlane.xlu0 %1432 }
 0x6d2   : > { %v1439_v60 = vsub.f32 %v1417_v45, %v1433_v59 }
 0x6d4   : > { %v1445_v61 = vmul.f32 1.442695, %v1439_v60 }
 0x6d5   : > { %v1436_v62 = vpop.xlane.xlu0 %1435 }
 0x6d6   : > { %v3843_v55 = vpop.eup %3842  ;;  %v1440_v63 = vsub.f32 %v1422_v46, %v1436_v62  ;;  %3846 = vpow2.f32 %v1445_v61 }
 0x6d7   : > { %v3845_v56 = vpop.eup %3844  ;;  %v1452_v57 = vsel %vm1020_vm4, %v3843_v55, 0.0 }
 0x6d8   : > { %1453 = vadd.xlane.f32.xlu1 %v1452_v57  ;;  %v1449_v58 = vsel %vm1020_vm4, %v3845_v56, 0.0  ;;  %v1447_v0 = vmul.f32 1.442695, %v1440_v63 }
 0x6d9   : > { %1450 = vadd.xlane.f32.xlu0 %v1449_v58 }
 0x6da   : > { %3848 = vpow2.f32 %v1447_v0 }
 0x6e0   : > { %v3847_v1 = vpop.eup %3846 }
 0x6e1   : > { %v1455_v2 = vsel %vm1020_vm4, %v3847_v1, 0.0 }
 0x6e4   : > { %v3849_v3 = vpop.eup %3848 }
 0x6e5   : > { %v1458_v5 = vsel %vm1020_vm4, %v3849_v3, 0.0 }
 0x6e9   : > { %3756 = vrot.lane.b32.xlu1 %v4519_v11, %s4118_s8 }
 0x6ed   : > { %3761 = vrot.lane.b32.xlu1 %v4523_v12, %s4119_s15 }
 0x6ef   : > { %3751 = vrot.lane.b32.xlu0 %v4523_v12, %s4118_s8 }
 0x6f1   : > { %3766 = vrot.lane.b32.xlu1 %v4519_v11, %s4119_s15 }
 0x70e   : > { %1456 = vadd.xlane.f32.xlu0 %v1455_v2 }
 0x715   : > { %1459 = vadd.xlane.f32.xlu1 %v1458_v5 }
 0x724   : > { %1664 = vrot.lane.b32.xlu0 %v4507_v6, %s4120_s13 }
 0x726   : > { %1666 = vrot.lane.b32.xlu1 %v4513_v10, %s4120_s13 }
 0x728   : > { %1755 = vrot.lane.b32.xlu0 %v4505_v4, %s4120_s13 }
 0x72a   : > { %1757 = vrot.lane.b32.xlu1 %v4509_v8, %s4120_s13 }
 0x765   : > { %v1454_v7 = vpop.xlane.xlu1 %1453 }
 0x766   : > { %3850 = vrcp.f32 %v1454_v7  ;;  %v1451_v9 = vpop.xlane.xlu0 %1450 }
 0x767   : > { %3852 = vrcp.f32 %v1451_v9 }
 0x769   : > { %v3757_v13 = vpop.permute.xlu1 %3756 }
 0x76a   : > { %v3752_v14 = vpop.permute.xlu0 %3751  ;;  %v3759_v15 = vunpack.i.h.bf16 %v3757_v13  ;;  %v3758_v16 = vunpack.i.l.bf16 %v3757_v13 }
 0x76b   : > { %v3754_v17 = vunpack.i.h.bf16 %v3752_v14  ;;  %v3753_v18 = vunpack.i.l.bf16 %v3752_v14 }
 0x76c   : > { %v3578_v26 = vpack.c.bf16 %v3759_v15, %v3758_v16 }
 0x76d   : > { %v3574_v20 = vpack.c.bf16 %v3754_v17, %v3753_v18  ;;  %v3762_v21 = vpop.permute.xlu1 %3761 }
 0x76e   : > { %v3764_v23 = vunpack.i.h.bf16 %v3762_v21  ;;  %v3763_v25 = vunpack.i.l.bf16 %v3762_v21 }
 0x76f   : > { %3575 = vmatprep.subr.bf16.mxu1 %v3574_v20 }
 0x770   : > { %v3851_v27 = vpop.eup %3850  ;;  %v3582_v28 = vpack.c.bf16 %v3764_v23, %v3763_v25  ;;  %3577 = vmatpush3.bf16.msra.mxu1 %v3574_v20 }
 0x771   : > { %v3853_v29 = vpop.eup %3852  ;;  %v3767_v30 = vpop.permute.xlu1 %3766  ;;  %3579 = vmatprep.subr.bf16.mxu1 %v3578_v26  ;;  %v1464_v34 = vmul.f32 %v3851_v27, %v3843_v55 }
 0x772   : > { %v3769_v31 = vunpack.i.h.bf16 %v3767_v30  ;;  %v3768_v32 = vunpack.i.l.bf16 %v3767_v30  ;;  %3584 = vmatprep.subr.msk.bf16.mxu0 %vm4529_vm3, %v3582_v28  ;;  %v1462_v33 = vmul.f32 %v3853_v29, %v3845_v56 }
 0x773   : > { %3587 = vmatpush3.bf16.xpose.msk.msra.mxu0 %vm4529_vm3, %v3582_v28 }
 0x774   : > { %v3588_v35 = vpack.c.bf16 %v3769_v31, %v3768_v32  ;;  %3437 = vmatprep.mubr.msk.f32.mxu1 %vm1020_vm4, %v1462_v33 }
 0x775   : > { %3438 = vmatmul.mubr.msk.f32.vlgmr.msra.gmra.mrb[12].mxu1 %vm1020_vm4, %v1464_v34 }
 0x776   : > { %3581 = vmatpush3.bf16.msra.mxu1 %v3578_v26 }
 0x777   : > { %3590 = vmatprep.subr.msk.bf16.mxu1 %vm4529_vm3, %v3588_v35 }
 0x79b   : > { %v1457_v36 = vpop.xlane.xlu0 %1456 }
 0x79c   : > { %3854 = vrcp.f32 %v1457_v36 }
 0x79f   : > { %v1665_v37 = vpop.permute.xlu0 %1664 }
 0x7a0   : > { %3451 = vmatprep.mubr.msk.f32.mxu0 %vm847_vm2, %v1665_v37 }
 0x7a2   : > { %v1460_v38 = vpop.xlane.xlu1 %1459 }
 0x7a3   : > { %3856 = vrcp.f32 %v1460_v38  ;;  %v1756_v44 = vpop.permute.xlu0 %1755 }
 0x7a6   : > { %v3855_v39 = vpop.eup %3854  ;;  %v1667_v40 = vpop.permute.xlu1 %1666 }
 0x7a7   : > { %3452 = vmatmul.mubr.msk.f32.vlgmr.msra.gmra.mrb[4].mxu0 %vm847_vm2, %v1667_v40  ;;  %v1466_v41 = vmul.f32 %v3855_v39, %v3847_v1 }
 0x7a9   : > { %3444 = vmatprep.mubr.msk.f32.mxu1 %vm1020_vm4, %v1466_v41 }
 0x7aa   : > { %v1758_v45 = vpop.permute.xlu1 %1757 }
 0x7ad   : > { %v3857_v42 = vpop.eup %3856 }
 0x7ae   : > { %v1468_v43 = vmul.f32 %v3857_v42, %v3849_v3 }
 0x7b0   : > { %3445 = vmatmul.mubr.msk.f32.vlgmr.msra.gmra.mrb[14].mxu1 %vm1020_vm4, %v1468_v43 }
 0x7b1   : > { %3593 = vmatpush3.bf16.xpose.msk.msra.mxu1 %vm4529_vm3, %v3588_v35  ;;  %3458 = vmatprep.mubr.msk.f32.mxu1 %vm847_vm2, %v1756_v44 }
 0x7b8   : > { %3459 = vmatmul.mubr.msk.f32.vlgmr.msra.gmra.mrb[16].mxu1 %vm847_vm2, %v1758_v45 }
 0x848   : > { %v4629_v46 = vpop.f32.mrb[12].mxu1 }
 0x849   : > { %v4631_v47 = vpop.f32.mrb[13].mxu1 }
 0x87a   : > { %v3453_v48 = vpop.f32.mrb[4].mxu0 }
 0x87b   : > { %v1752_v49 = vadd.f32 %v3453_v48, %v4545_v22  ;;  %v1746_v50 = vpop.f32.mrb[5].mxu0 }
 0x87c   : > { %v1747_v51 = vadd.f32 %v1746_v50, %v4547_v24 }
 0x87d   : > { %v1849_v52 = vsel %vm1020_vm4, %v1752_v49, -inf }
 0x87e   : > { %1850 = vmax.xlane.f32.xlu1 %v1849_v52  ;;  %v1846_v53 = vsel %vm1020_vm4, %v1747_v51, -inf }
 0x87f   : > { %1847 = vmax.xlane.f32.xlu0 %v1846_v53 }
 0x883   : > { %v4637_v54 = vpop.f32.mrb[14].mxu1 }
 0x884   : > { %v4639_v55 = vpop.f32.mrb[15].mxu1 }
 0x88b   : > { %v3460_v56 = vpop.f32.mrb[16].mxu1 }
 0x88c   : > { %v1837_v57 = vpop.f32.mrb[17].mxu1  ;;  %v1843_v59 = vadd.f32 %v3460_v56, %v4545_v22 }
 0x88d   : > { %v1838_v58 = vadd.f32 %v1837_v57, %v4547_v24 }
 0x88e   : > { %v1855_v61 = vsel %vm1020_vm4, %v1843_v59, -inf }
 0x88f   : > { %v1852_v60 = vsel %vm1020_vm4, %v1838_v58, -inf }
 0x890   : > { %1853 = vmax.xlane.f32.xlu0 %v1852_v60 }
 0x894   : > { %1856 = vmax.xlane.f32.xlu0 %v1855_v61 }
 0x90b   : > { %v1851_v62 = vpop.xlane.xlu1 %1850 }
 0x90c   : > { %v1859_v63 = vsub.f32 %v1752_v49, %v1851_v62  ;;  %v1848_v0 = vpop.xlane.xlu0 %1847 }
 0x90d   : > { %v1858_v1 = vsub.f32 %v1747_v51, %v1848_v0 }
 0x90e   : > { %v1864_v2 = vmul.f32 1.442695, %v1859_v63 }
 0x90f   : > { %v1862_v3 = vmul.f32 1.442695, %v1858_v1 }
 0x910   : > { %3858 = vpow2.f32 %v1864_v2 }
 0x911   : > { %3860 = vpow2.f32 %v1862_v3 }
 0x91a   : > { %v3859_v5 = vpop.eup %3858 }
 0x91b   : > { %v3861_v7 = vpop.eup %3860  ;;  %v1873_v9 = vsel %vm1020_vm4, %v3859_v5, 0.0 }
 0x91c   : > { %1874 = vadd.xlane.f32.xlu1 %v1873_v9  ;;  %v1870_v13 = vsel %vm1020_vm4, %v3861_v7, 0.0 }
 0x91d   : > { %1871 = vadd.xlane.f32.xlu0 %v1870_v13  ;;  %v1854_v14 = vpop.xlane.xlu0 %1853 }
 0x91e   : > { %v1860_v15 = vsub.f32 %v1838_v58, %v1854_v14 }
 0x920   : > { %v1866_v16 = vmul.f32 1.442695, %v1860_v15 }
 0x921   : > { %v1857_v17 = vpop.xlane.xlu0 %1856 }
 0x922   : > { %v1861_v18 = vsub.f32 %v1843_v59, %v1857_v17  ;;  %3862 = vpow2.f32 %v1866_v16 }
 0x924   : > { %v1868_v20 = vmul.f32 1.442695, %v1861_v18 }
 0x926   : > { %3864 = vpow2.f32 %v1868_v20 }
 0x92c   : > { %v3863_v21 = vpop.eup %3862 }
 0x92d   : > { %3776 = vrot.lane.b32.xlu1 %v4519_v11, %s4121_s27  ;;  %v1876_v23 = vsel %vm1020_vm4, %v3863_v21, 0.0 }
 0x930   : > { %v3865_v25 = vpop.eup %3864 }
 0x931   : > { %3781 = vrot.lane.b32.xlu1 %v4523_v12, %s4122_s0  ;;  %v1879_v26 = vsel %vm1020_vm4, %v3865_v25, 0.0 }
 0x933   : > { %3771 = vrot.lane.b32.xlu0 %v4523_v12, %s4121_s27 }
 0x935   : > { %3786 = vrot.lane.b32.xlu1 %v4519_v11, %s4122_s0 }
 0x952   : > { %1877 = vadd.xlane.f32.xlu0 %v1876_v23 }
 0x959   : > { %1880 = vadd.xlane.f32.xlu1 %v1879_v26 }
 0x968   : > { %2085 = vrot.lane.b32.xlu0 %v4507_v6, %s4123_s23 }
 0x96a   : > { %2087 = vrot.lane.b32.xlu1 %v4513_v10, %s4123_s23 }
 0x96c   : > { %2176 = vrot.lane.b32.xlu0 %v4505_v4, %s4123_s23 }
 0x96e   : > { %2178 = vrot.lane.b32.xlu1 %v4509_v8, %s4123_s23 }
 0x9a9   : > { %v1875_v27 = vpop.xlane.xlu1 %1874 }
 0x9aa   : > { %3866 = vrcp.f32 %v1875_v27  ;;  %v1872_v28 = vpop.xlane.xlu0 %1871 }
 0x9ab   : > { %3868 = vrcp.f32 %v1872_v28 }
 0x9ad   : > { %v3777_v29 = vpop.permute.xlu1 %3776 }
 0x9ae   : > { %v3779_v30 = vunpack.i.h.bf16 %v3777_v29  ;;  %v3778_v31 = vunpack.i.l.bf16 %v3777_v29  ;;  %v3772_v32 = vpop.permute.xlu0 %3771 }
 0x9af   : > { %v3774_v33 = vunpack.i.h.bf16 %v3772_v32  ;;  %v3773_v34 = vunpack.i.l.bf16 %v3772_v32 }
 0x9b0   : > { %v3598_v35 = vpack.c.bf16 %v3779_v30, %v3778_v31 }
 0x9b1   : > { %v3594_v36 = vpack.c.bf16 %v3774_v33, %v3773_v34  ;;  %v3782_v37 = vpop.permute.xlu1 %3781 }
 0x9b2   : > { %v3784_v6 = vunpack.i.h.bf16 %v3782_v37  ;;  %v3783_v38 = vunpack.i.l.bf16 %v3782_v37  ;;  %3599 = vmatprep.subr.bf16.mxu1 %v3598_v35 }
 0x9b3   : > { %3595 = vmatprep.subr.bf16.mxu0 %v3594_v36  ;;  %3601 = vmatpush3.bf16.msra.mxu1 %v3598_v35 }
 0x9b4   : > { %v3867_v4 = vpop.eup %3866  ;;  %v3602_v8 = vpack.c.bf16 %v3784_v6, %v3783_v38  ;;  %3597 = vmatpush3.bf16.msra.mxu0 %v3594_v36 }
 0x9b5   : > { %v3869_v10 = vpop.eup %3868  ;;  %v3787_v39 = vpop.permute.xlu1 %3786  ;;  %v1885_v43 = vmul.f32 %v3867_v4, %v3859_v5 }
 0x9b6   : > { %v3789_v40 = vunpack.i.h.bf16 %v3787_v39  ;;  %v3788_v41 = vunpack.i.l.bf16 %v3787_v39  ;;  %3604 = vmatprep.subr.msk.bf16.mxu0 %vm4529_vm3, %v3602_v8  ;;  %v1883_v42 = vmul.f32 %v3869_v10, %v3861_v7 }
 0x9b8   : > { %v3608_v44 = vpack.c.bf16 %v3789_v40, %v3788_v41  ;;  %3465 = vmatprep.mubr.msk.f32.mxu0 %vm1020_vm4, %v1883_v42 }
 0x9b9   : > { %3466 = vmatmul.mubr.msk.f32.vlgmr.msra.gmra.mrb[6].mxu0 %vm1020_vm4, %v1885_v43 }
 0x9ba   : > { %3610 = vmatprep.subr.msk.bf16.mxu1 %vm4529_vm3, %v3608_v44 }
 0x9bd   : > { %3607 = vmatpush3.bf16.xpose.msk.msra.mxu0 %vm4529_vm3, %v3602_v8 }
 0x9df   : > { %v1878_v45 = vpop.xlane.xlu0 %1877 }
 0x9e0   : > { %3870 = vrcp.f32 %v1878_v45 }
 0x9e3   : > { %v2086_v48 = vpop.permute.xlu0 %2085 }
 0x9e4   : > { %3479 = vmatprep.mubr.msk.f32.mxu0 %vm847_vm2, %v2086_v48 }
 0x9e6   : > { %v1881_v49 = vpop.xlane.xlu1 %1880 }
 0x9e7   : > { %3872 = vrcp.f32 %v1881_v49  ;;  %v2177_v57 = vpop.permute.xlu0 %2176 }
 0x9ea   : > { %v3871_v50 = vpop.eup %3870  ;;  %v2088_v51 = vpop.permute.xlu1 %2087 }
 0x9eb   : > { %3480 = vmatmul.mubr.msk.f32.vlgmr.msra.gmra.mrb[8].mxu0 %vm847_vm2, %v2088_v51  ;;  %v1887_v52 = vmul.f32 %v3871_v50, %v3863_v21 }
 0x9ed   : > { %3472 = vmatprep.mubr.msk.f32.mxu1 %vm1020_vm4, %v1887_v52 }
 0x9ee   : > { %v2179_v58 = vpop.permute.xlu1 %2178 }
 0x9f1   : > { %v3873_v53 = vpop.eup %3872 }
 0x9f2   : > { %v1889_v56 = vmul.f32 %v3873_v53, %v3865_v25 }
 0x9f4   : > { %3473 = vmatmul.mubr.msk.f32.vlgmr.msra.gmra.mrb[18].mxu1 %vm1020_vm4, %v1889_v56 }
 0x9f5   : > { %3613 = vmatpush3.bf16.xpose.msk.msra.mxu1 %vm4529_vm3, %v3608_v44  ;;  %3486 = vmatprep.mubr.msk.f32.mxu1 %vm847_vm2, %v2177_v57 }
 0x9fc   : > { %3487 = vmatmul.mubr.msk.f32.vlgmr.msra.gmra.mrb[20].mxu1 %vm847_vm2, %v2179_v58 }
 0xa8c   : > { %v3467_v59 = vpop.f32.mrb[6].mxu0 }
 0xa8d   : > { %v1968_v60 = vpop.f32.mrb[7].mxu0 }
 0xabe   : > { %v3481_v61 = vpop.f32.mrb[8].mxu0 }
 0xabf   : > { %v2173_v62 = vadd.f32 %v3481_v61, %v4545_v22  ;;  %v2167_v63 = vpop.f32.mrb[9].mxu0 }
 0xac0   : > { %v2168_v0 = vadd.f32 %v2167_v63, %v4547_v24 }
 0xac1   : > { %v2270_v1 = vsel %vm1020_vm4, %v2173_v62, -inf }
 0xac2   : > { %2271 = vmax.xlane.f32.xlu1 %v2270_v1  ;;  %v2267_v2 = vsel %vm1020_vm4, %v2168_v0, -inf }
 0xac3   : > { %2268 = vmax.xlane.f32.xlu0 %v2267_v2 }
 0xac7   : > { %v3474_v19 = vpop.f32.mrb[18].mxu1 }
 0xac8   : > { %v2055_v3 = vpop.f32.mrb[19].mxu1 }
 0xacf   : > { %v3488_v5 = vpop.f32.mrb[20].mxu1 }
 0xad0   : > { %v2258_v7 = vpop.f32.mrb[21].mxu1  ;;  %v2264_v13 = vadd.f32 %v3488_v5, %v4545_v22 }
 0xad1   : > { %v2259_v9 = vadd.f32 %v2258_v7, %v4547_v24 }
 0xad2   : > { %v2276_v15 = vsel %vm1020_vm4, %v2264_v13, -inf }
 0xad3   : > { %v2273_v14 = vsel %vm1020_vm4, %v2259_v9, -inf }
 0xad4   : > { %2274 = vmax.xlane.f32.xlu0 %v2273_v14 }
 0xad8   : > { %2277 = vmax.xlane.f32.xlu0 %v2276_v15 }
 0xb4f   : > { %v2272_v16 = vpop.xlane.xlu1 %2271 }
 0xb50   : > { %v2280_v17 = vsub.f32 %v2173_v62, %v2272_v16  ;;  %v2269_v18 = vpop.xlane.xlu0 %2268 }
 0xb51   : > { %v2279_v20 = vsub.f32 %v2168_v0, %v2269_v18 }
 0xb52   : > { %v2285_v21 = vmul.f32 1.442695, %v2280_v17  ;;  %v3264_v17 = vld [vmem:[%s654_s22] ss:$0 sm:$0xff] }
 0xb53   : > { %v2283_v23 = vmul.f32 1.442695, %v2279_v20  ;;  %v3914_v20 = vld [vmem:[#allocation2 + $0x10] sm:$0xff] }
 0xb54   : > { %3874 = vpow2.f32 %v2285_v21 }
 0xb55   : > { %3876 = vpow2.f32 %v2283_v23  ;;  %v3915_v23 = vld [vmem:[#allocation2] sm:$0xff] }
 0xb5e   : > { %v3875_v25 = vpop.eup %3874 }
 0xb5f   : > { %v3877_v26 = vpop.eup %3876  ;;  %v2294_v24 = vsel %vm1020_vm4, %v3875_v25, 0.0 }
 0xb60   : > { %2295 = vadd.xlane.f32.xlu1 %v2294_v24  ;;  %v2291_v22 = vsel %vm1020_vm4, %v3877_v26, 0.0 }
 0xb61   : > { %v2275_v27 = vpop.xlane.xlu0 %2274  ;;  %2292 = vadd.xlane.f32.xlu0 %v2291_v22 }
 0xb62   : > { %v2281_v28 = vsub.f32 %v2259_v9, %v2275_v27  ;;  %v3916_v27 = vld [vmem:[#allocation2 + $0x8] sm:$0xff] }
 0xb64   : > { %v2287_v29 = vmul.f32 1.442695, %v2281_v28 }
 0xb65   : > { %v2278_v30 = vpop.xlane.xlu0 %2277 }
 0xb66   : > { %3878 = vpow2.f32 %v2287_v29  ;;  %v2282_v31 = vsub.f32 %v2264_v13, %v2278_v30  ;;  %v3917_v30 = vld [vmem:[#allocation2 + $0x18] sm:$0xff] }
 0xb68   : > { %v2289_v32 = vmul.f32 1.442695, %v2282_v31 }
 0xb6a   : > { %3880 = vpow2.f32 %v2289_v32 }
 0xb70   : > { %v3879_v33 = vpop.eup %3878 }
 0xb71   : > { %v2297_v34 = vsel %vm1020_vm4, %v3879_v33, 0.0 }
 0xb72   : > { %2298 = vadd.xlane.f32.xlu0 %v2297_v34 }
 0xb74   : > { %v3881_v35 = vpop.eup %3880 }
 0xb75   : > { %v2300_v36 = vsel %vm1020_vm4, %v3881_v35, 0.0 }
 0xb76   : > { %2301 = vadd.xlane.f32.xlu1 %v2300_v36 }
 0xb87   : > { %3796 = vrot.lane.b32.xlu1 %v4519_v11, %s4124_s16 }
 0xb88   : > { %3791 = vrot.lane.b32.xlu0 %v4523_v12, %s4124_s16 }
 0xb8b   : > { %1647 = vrot.lane.b32.xlu1 %v4631_v47, %s4125_s10 }
 0xb8c   : > { %1651 = vrot.lane.b32.xlu0 %v4639_v55, %s4125_s10 }
 0xb8f   : > { %1649 = vrot.lane.b32.xlu1 %v4629_v46, %s4125_s10 }
 0xb90   : > { %2068 = vrot.lane.b32.xlu0 %v1968_v60, %s4126_s19  ;;  %v3803_v60 = vld [vmem:[%s4446_s28 + $0x8] sm:$0xff]  }
 0xb93   : > { %1653 = vrot.lane.b32.xlu1 %v4637_v54, %s4125_s10 }
 0xb94   : > { %2072 = vrot.lane.b32.xlu0 %v2055_v3, %s4126_s19 }
 0xb97   : > { %2070 = vrot.lane.b32.xlu1 %v3467_v59, %s4126_s19  ;;  %v3802_v59 = vld [vmem:[%s4446_s28] sm:$0xff]  }
 0xb9b   : > { %2074 = vrot.lane.b32.xlu1 %v3474_v19, %s4126_s19 }
 0xbed   : > { %v2296_v11 = vpop.xlane.xlu1 %2295 }
 0xbee   : > { %v2293_v37 = vpop.xlane.xlu0 %2292 }
 0xbef   : > { %3882 = vrcp.f32 %v2293_v37 }
 0xbf0   : > { %3884 = vrcp.f32 %v2296_v11 }
 0xbf9   : > { %v3883_v6 = vpop.eup %3882 }
 0xbfa   : > { %v2304_v38 = vmul.f32 %v3883_v6, %v3877_v26  ;;  %v3885_v8 = vpop.eup %3884 }
 0xbfb   : > { %v2306_v43 = vmul.f32 %v3885_v8, %v3875_v25 }
 0xbfc   : > { %3493 = vmatprep.mubr.msk.f32.mxu0 %vm1020_vm4, %v2304_v38 }
 0xbff   : > { %v2299_v12 = vpop.xlane.xlu0 %2298 }
 0xc00   : > { %3886 = vrcp.f32 %v2299_v12 }
 0xc03   : > { %v2302_v47 = vpop.xlane.xlu1 %2301  ;;  %v3792_v55 = vpop.permute.xlu0 %3791 }
 0xc04   : > { %3888 = vrcp.f32 %v2302_v47  ;;  %v3794_v46 = vunpack.i.h.bf16 %v3792_v55  ;;  %v3793_v4 = vunpack.i.l.bf16 %v3792_v55 }
 0xc06   : > { %v3614_v54 = vpack.c.bf16 %v3794_v46, %v3793_v4 }
 0xc07   : > { %v3797_v10 = vpop.permute.xlu1 %3796  ;;  %v1652_v39 = vpop.permute.xlu0 %1651 }
 0xc08   : > { %v3799_v40 = vunpack.i.h.bf16 %v3797_v10  ;;  %v3798_v41 = vunpack.i.l.bf16 %v3797_v10  ;;  %1662 = vst.msk [vmem:[#allocation3 + $0x10] sm:$0xff] %vm1659_vm5, %v1652_v39  ;;  %3615 = vmatprep.subr.bf16.mxu0 %v3614_v54 }
 0xc09   : > { %3617 = vmatpush3.bf16.msra.mxu0 %v3614_v54 }
 0xc0a   : > { %v3887_v42 = vpop.eup %3886  ;;  %v3618_v44 = vpack.c.bf16 %v3799_v40, %v3798_v41  ;;  %3503 = vmatprep.subr.bf16.mxu0 %v3802_v59 }
 0xc0b   : > { %v1648_v45 = vpop.permute.xlu1 %1647  ;;  %v2069_v48 = vpop.permute.xlu0 %2068  ;;  %v2308_v49 = vmul.f32 %v3887_v42, %v3879_v33 }
 0xc0c   : > { %1660 = vst.msk [vmem:[#allocation3] sm:$0xff] %vm1659_vm5, %v1648_v45  ;;  %3494 = vmatmul.mubr.msk.f32.vlgmr.msra.gmra.mrb[10].mxu0 %vm1020_vm4, %v2306_v43  ;;  %3619 = vmatprep.subr.bf16.mxu1 %v3618_v44 }
 0xc0d   : > { %2081 = vst.msk [vmem:[#allocation3] sm:$0xff] %vm2080_vm6, %v2069_v48  ;;  %3621 = vmatpush3.bf16.msra.mxu1 %v3618_v44  ;;  %3500 = vmatprep.mubr.msk.f32.mxu1 %vm1020_vm4, %v2308_v49 }
 0xc0e   : > { %v3889_v50 = vpop.eup %3888  ;;  %3504 = vmatpush3.bf16.msra.mxu0 %v3802_v59 }
 0xc0f   : > { %v2310_v51 = vmul.f32 %v3889_v50, %v3881_v35  ;;  %v1650_v52 = vpop.permute.xlu1 %1649  ;;  %v2073_v53 = vpop.permute.xlu0 %2072  ;;  %3505 = vmatprep.subr.bf16.mxu0 %v3803_v60  ;;  %v3806_v50 = vld [vmem:[%s4456_s29 + $0x4] ss:$8 sps:$4 sm:$0xff]  }
 0xc10   : > { %1661 = vst.msk [vmem:[#allocation3 + $0x8] sm:$0xff] %vm1659_vm5, %v1650_v52  ;;  %2704 = vmatprep.subr.bf16.mxu1 %v3806_v50  ;;  %v3809_v52 = vld [vmem:[%s4456_s29 + $0x14] ss:$8 sps:$4 sm:$0xff]  }
 0xc11   : > { %2083 = vst.msk [vmem:[#allocation3 + $0x10] sm:$0xff] %vm2080_vm6, %v2073_v53  ;;  %3501 = vmatmul.mubr.msk.f32.vlgmr.msra.gmra.mrb[22].mxu1 %vm1020_vm4, %v2310_v51  ;;  %v3804_v51 = vld [vmem:[%s4456_s29] ss:$8 sps:$4 sm:$0xff]   ;;  %v3807_v53 = vld [vmem:[%s4456_s29 + $0x10] ss:$8 sps:$4 sm:$0xff]  }
 0xc12   : > { %3506 = vmatpush3.bf16.msra.mxu0 %v3803_v60  ;;  %2705 = vmatpush1.bf16.msra.mxu1 %v3804_v51 }
 0xc13   : > { %v1654_v56 = vpop.permute.xlu1 %1653  ;;  %2706 = vmatprep.subr.bf16.mxu1 %v3809_v52 }
 0xc14   : > { %1663 = vst.msk [vmem:[#allocation3 + $0x18] sm:$0xff] %vm1659_vm5, %v1654_v56  ;;  %v4128_v56 = vmov 0  }
 0xc15   : > { %2736 = vmatprep.mubr.bf16.mxu1 %v4128_v56 }
 0xc16   : > { %2707 = vmatpush1.bf16.msra.mxu1 %v3807_v53 }
 0xc17   : > { %v2071_v57 = vpop.permute.xlu1 %2070 }
 0xc18   : > { %2082 = vst.msk [vmem:[#allocation3 + $0x8] sm:$0xff] %vm2080_vm6, %v2071_v57 }
 0xc1b   : > { %v2075_v58 = vpop.permute.xlu1 %2074 }
 0xc1c   : > { %2084 = vst.msk [vmem:[#allocation3 + $0x18] sm:$0xff] %vm2080_vm6, %v2075_v58 }
 0xcdf   : > { %v3495_v61 = vpop.f32.mrb[10].mxu0 }
 0xce0   : > { %2491 = vrot.lane.b32.xlu1 %v3495_v61, %s4127_s17  ;;  %v2389_v62 = vpop.f32.mrb[11].mxu0 }
 0xce1   : > { %2489 = vrot.lane.b32.xlu0 %v2389_v62, %s4127_s17 }
 0xce4   : > { %v3502_v63 = vpop.f32.mrb[22].mxu1 }
 0xce5   : > { %v2476_v0 = vpop.f32.mrb[23].mxu1  ;;  %2495 = vrot.lane.b32.xlu1 %v3502_v63, %s4127_s17 }
 0xce6   : > { %2493 = vrot.lane.b32.xlu0 %v2476_v0, %s4127_s17 }
 0xd52   : > { %v2492_v1 = vpop.permute.xlu1 %2491 }
 0xd53   : > { %2503 = vst.msk [vmem:[#allocation3 + $0x8] sm:$0xff] %vm2501_vm7, %v2492_v1  ;;  %v2490_v2 = vpop.permute.xlu0 %2489 }
 0xd54   : > { %2502 = vst.msk [vmem:[#allocation3] sm:$0xff] %vm2501_vm7, %v2490_v2 }
 0xd57   : > { %v2496_v19 = vpop.permute.xlu1 %2495 }
 0xd58   : > { %2505 = vst.msk [vmem:[#allocation3 + $0x18] sm:$0xff] %vm2501_vm7, %v2496_v19  ;;  %v2494_v3 = vpop.permute.xlu0 %2493 }
 0xd59   : > { %2504 = vst.msk [vmem:[#allocation3 + $0x10] sm:$0xff] %vm2501_vm7, %v2494_v3 }
 0xd5a   : > { %v2507_v5 = vld [vmem:[#allocation3 + $0x8] sm:$0xff] }
 0xd5b   : > { %v2506_v7 = vld [vmem:[#allocation3] sm:$0xff] }
 0xd5c   : > { %v2510_v9 = vpack.c.bf16 %v2507_v5, %v2506_v7  ;;  %v3265_v7 = vld [vmem:[%s4409_s18] ss:$0 sm:$0xff] }
 0xd5e   : > { %3507 = vmatprep.mubr.msk.bf16.mxu0 %vm687_vm1, %v2510_v9 }
 0xd5f   : > { %v2509_v13 = vld [vmem:[#allocation3 + $0x18] sm:$0xff] }
 0xd60   : > { %v2508_v14 = vld [vmem:[#allocation3 + $0x10] sm:$0xff] }
 0xd61   : > { %v2511_v15 = vpack.c.bf16 %v2509_v13, %v2508_v14 }
 0xd63   : > { %3508 = vmatmul.mubr.msk.bf16.vlgmr.msra.gmra.mrb[12].mxu0 %vm687_vm1, %v2511_v15 }
 0xe36   : > { %v3509_v16 = vpop.f32.mrb[12].mxu0 }
 0xe37   : > { %v2568_v18 = vpop.f32.mrb[13].mxu0  ;;  %v2585_v21 = vadd.f32 %v3914_v20, %v3509_v16 }
 0xe38   : > { %v2583_v25 = vadd.f32 %v3915_v23, %v2568_v18  ;;  %v3510_v26 = vpop.f32.mrb[14].mxu0 }
 0xe39   : > { %v2571_v24 = vpop.f32.mrb[15].mxu0  ;;  %v4714_v29 = vadd.f32 %v3264_v17, %v2585_v21  ;;  %v2586_v31 = vadd.f32 %v3917_v30, %v3510_v26 }
 0xe3a   : > { %v4712_v22 = vadd.f32 %v3264_v17, %v2583_v25  ;;  %v2584_v28 = vadd.f32 %v3916_v27, %v2571_v24 }
 0xe3b   : > { %v4722_v35 = vadd.f32 %v3264_v17, %v2586_v31  ;;  %v2606_v36 = vsel %vm687_vm1, %v4714_v29, 0.0 }
 0xe3c   : > { %v4716_v32 = vadd.f32 %v3264_v17, %v2584_v28  ;;  %v2600_v33 = vsel %vm687_vm1, %v4712_v22, 0.0  ;;  %v3266_v17 = vld [vmem:[%s4415_s24] ss:$0 sm:$0xff]  ;;  %s4858_s24 = sld [smem:[#allocation25_spill]] (!%p3285_p12) }
 0xe3d   : > { %2601 = vadd.xlane.f32.xlu0 %v2600_v33  ;;  %v2609_v37 = vsel %vm687_vm1, %v4722_v35, 0.0 }
 0xe3e   : > { %v2603_v34 = vsel %vm687_vm1, %v4716_v32, 0.0 }
 0xe3f   : > { %2604 = vadd.xlane.f32.xlu1 %v2603_v34  ;;  %v3810_v34 = vld [vmem:[%s4462_s1] sm:$0xff]  }
 0xe40   : > { %3511 = vmatprep.subr.bf16.mxu0 %v3810_v34 }
 0xe41   : > { %2607 = vadd.xlane.f32.xlu0 %v2606_v36  ;;  %3512 = vmatpush3.bf16.msra.mxu0 %v3810_v34  ;;  %v3811_v36 = vld [vmem:[%s4462_s1 + $0x8] sm:$0xff]  }
 0xe42   : > { %3513 = vmatprep.subr.bf16.mxu0 %v3811_v36 }
 0xe45   : > { %2610 = vadd.xlane.f32.xlu0 %v2609_v37  ;;  %3514 = vmatpush3.bf16.msra.mxu0 %v3811_v36  ;;  %v3812_v37 = vld [vmem:[%s4462_s1 + $0x10] sm:$0xff]  }
 0xe46   : > { %3515 = vmatprep.subr.bf16.mxu0 %v3812_v37 }
 0xe49   : > { %3516 = vmatpush3.bf16.msra.mxu0 %v3812_v37 }
 0xeca   : > { %v2602_v6 = vpop.xlane.xlu0 %2601 }
 0xecb   : > { %v2612_v11 = vmul.f32 0.03125, %v2602_v6  ;;  %v3813_v6 = vld [vmem:[%s4462_s1 + $0x18] sm:$0xff]  }
 0xecc   : > { %v2605_v38 = vpop.xlane.xlu1 %2604  ;;  %3517 = vmatprep.subr.bf16.mxu0 %v3813_v6 }
 0xecd   : > { %v2616_v12 = vsub.f32 %v4712_v22, %v2612_v11  ;;  %v2613_v47 = vmul.f32 0.03125, %v2605_v38  ;;  %3518 = vmatpush3.bf16.msra.mxu0 %v3813_v6  ;;  %v3814_v11 = vld [vmem:[%s4462_s1 + $0x20] sm:$0xff]   ;;  %v3815_v38 = vld [vmem:[%s4462_s1 + $0x28] sm:$0xff]  }
 0xece   : > { %v2608_v55 = vpop.xlane.xlu0 %2607  ;;  %3519 = vmatprep.subr.bf16.mxu0 %v3814_v11 }
 0xecf   : > { %v2617_v46 = vsub.f32 %v4716_v32, %v2613_v47  ;;  %v2614_v4 = vmul.f32 0.03125, %v2608_v55  ;;  %v2620_v54 = vmul.f32 %v2616_v12, %v2616_v12  ;;  %v3817_v47 = vld [vmem:[%s4462_s1 + $0x38] sm:$0xff]  }
 0xed1   : > { %v2618_v8 = vsub.f32 %v4714_v29, %v2614_v4  ;;  %v2624_v10 = vsel %vm687_vm1, %v2620_v54, 0.0  ;;  %v2621_v39 = vmul.f32 %v2617_v46, %v2617_v46  ;;  %3520 = vmatpush3.bf16.msra.mxu0 %v3814_v11 }
 0xed2   : > { %2625 = vadd.xlane.f32.xlu0 %v2624_v10  ;;  %v2611_v40 = vpop.xlane.xlu0 %2610  ;;  %3521 = vmatprep.subr.bf16.mxu0 %v3815_v38 }
 0xed3   : > { %v2615_v41 = vmul.f32 0.03125, %v2611_v40  ;;  %v2627_v42 = vsel %vm687_vm1, %v2621_v39, 0.0  ;;  %v2622_v43 = vmul.f32 %v2618_v8, %v2618_v8 }
 0xed4   : > { %2628 = vadd.xlane.f32.xlu1 %v2627_v42 }
 0xed5   : > { %v2619_v44 = vsub.f32 %v4722_v35, %v2615_v41  ;;  %v2630_v45 = vsel %vm687_vm1, %v2622_v43, 0.0  ;;  %3522 = vmatpush3.bf16.msra.mxu0 %v3815_v38 }
 0xed6   : > { %2631 = vadd.xlane.f32.xlu0 %v2630_v45 }
 0xed7   : > { %v2623_v48 = vmul.f32 %v2619_v44, %v2619_v44 }
 0xed9   : > { %v2633_v49 = vsel %vm687_vm1, %v2623_v48, 0.0 }
 0xeda   : > { %2634 = vadd.xlane.f32.xlu1 %v2633_v49 }
 0xf5f   : > { %v2626_v57 = vpop.xlane.xlu0 %2625 }
 0xf60   : > { %v2636_v58 = vmul.f32 0.03125, %v2626_v57 }
 0xf61   : > { %v2629_v59 = vpop.xlane.xlu1 %2628 }
 0xf62   : > { %v2640_v60 = vadd.f32 1e-05, %v2636_v58  ;;  %v2637_v61 = vmul.f32 0.03125, %v2629_v59 }
 0xf63   : > { %v2632_v62 = vpop.xlane.xlu0 %2631 }
 0xf64   : > { %3890 = vrsqrt.f32 %v2640_v60  ;;  %v2641_v63 = vadd.f32 1e-05, %v2637_v61  ;;  %v2638_v0 = vmul.f32 0.03125, %v2632_v62 }
 0xf66   : > { %3892 = vrsqrt.f32 %v2641_v63  ;;  %v2642_v1 = vadd.f32 1e-05, %v2638_v0 }
 0xf67   : > { %v2635_v2 = vpop.xlane.xlu1 %2634 }
 0xf68   : > { %3894 = vrsqrt.f32 %v2642_v1  ;;  %v2639_v19 = vmul.f32 0.03125, %v2635_v2 }
 0xf6a   : > { %v2643_v3 = vadd.f32 1e-05, %v2639_v19 }
 0xf6c   : > { %3896 = vrsqrt.f32 %v2643_v3 }
 0xf6e   : > { %v3891_v5 = vpop.eup %3890 }
 0xf6f   : > { %v2648_v9 = vmul.f32 %v3891_v5, %v2616_v12  ;;  %v3816_v12 = vld [vmem:[%s4462_s1 + $0x30] sm:$0xff]  }
 0xf70   : > { %v3893_v13 = vpop.eup %3892  ;;  %3523 = vmatprep.subr.bf16.mxu0 %v3816_v12 }
 0xf71   : > { %v2658_v14 = vmul.f32 %v3265_v7, %v2648_v9  ;;  %v2649_v15 = vmul.f32 %v3893_v13, %v2617_v46  ;;  %3524 = vmatpush3.bf16.msra.mxu0 %v3816_v12 }
 0xf72   : > { %v3895_v16 = vpop.eup %3894  ;;  %3525 = vmatprep.subr.bf16.mxu0 %v3817_v47 }
 0xf73   : > { %v2659_v18 = vmul.f32 %v3265_v7, %v2649_v15  ;;  %v2650_v20 = vmul.f32 %v3895_v16, %v2618_v8  ;;  %v2668_v21 = vadd.f32 %v3266_v17, %v2658_v14 }
 0xf75   : > { %v2669_v23 = vadd.f32 %v3266_v17, %v2659_v18  ;;  %v2660_v27 = vmul.f32 %v3265_v7, %v2650_v20  ;;  %3526 = vmatpush3.bf16.msra.mxu0 %v3817_v47 }
 0xf76   : > { %v3897_v25 = vpop.eup %3896 }
 0xf77   : > { %v2651_v26 = vmul.f32 %v3897_v25, %v2619_v44  ;;  %v2672_v24 = vpack.c.bf16 %v2669_v23, %v2668_v21  ;;  %v2670_v31 = vadd.f32 %v3266_v17, %v2660_v27  ;;  %v2925_v21 = vld [vmem:[#allocation10 + $0x8] sm:$0xff] (!%p3285_p12)  ;;  %v4129_v23 = vmov (!%p3285_p12), 0.0|0.0  }
 0xf78   : > { %3622 = vmatprep.subr.bf16.mxu0 (!%p3285_p12), %v4129_v23 }
 0xf79   : > { %3271 = vmatmul.mubr.msk.bf16.vlgmr.msra.gmra.mrb[24].mxu1 %vm687_vm1, %v2672_v24  ;;  %v2661_v28 = vmul.f32 %v3265_v7, %v2651_v26  ;;  %v2927_v26 = vld [vmem:[#allocation10 + $0x18] sm:$0xff] (!%p3285_p12) }
 0xf7a   : > { %2746 = vmatprep.mubr.bf16.mxu1 %v4128_v56 }
 0xf7b   : > { %v2671_v30 = vadd.f32 %v3266_v17, %v2661_v28 }
 0xf7d   : > { %v2673_v33 = vpack.c.bf16 %v2671_v30, %v2670_v31  ;;  %v3286_v30 = vld [vmem:[%s4858_s24] ss:$0 sm:$0xff] (!%p3285_p12) }
 0xf81   : > { %3272 = vmatmul.mubr.msk.bf16.gmra.mrb[28].mxu1 %vm687_vm1, %v2673_v33 }
0x104c   : > { %v2738_v55 = vpop.f32.mrb[24].mxu1 }
0x104d   : > { %v3273_v46 = vmul.f32 -1.442695, %v2738_v55  ;;  %v2740_v4 = vpop.f32.mrb[25].mxu1 }
0x104e   : > { %v2742_v54 = vpop.f32.mrb[26].mxu1 }
0x104f   : > { %3898 = vpow2.f32 %v3273_v46  ;;  %v3274_v8 = vmul.f32 -1.442695, %v2742_v54  ;;  %v2744_v10 = vpop.f32.mrb[27].mxu1 }
0x1051   : > { %3900 = vpow2.f32 %v3274_v8 }
0x1054   : > { %v2748_v39 = vpop.f32.mrb[28].mxu1 }
0x1055   : > { %v3275_v40 = vmul.f32 -1.442695, %v2748_v39  ;;  %v2750_v41 = vpop.f32.mrb[29].mxu1 }
0x1056   : > { %v2752_v42 = vpop.f32.mrb[30].mxu1 }
0x1057   : > { %3902 = vpow2.f32 %v3275_v40  ;;  %v3276_v43 = vmul.f32 -1.442695, %v2752_v42  ;;  %v2754_v44 = vpop.f32.mrb[31].mxu1 }
0x1059   : > { %v3899_v45 = vpop.eup %3898  ;;  %3904 = vpow2.f32 %v3276_v43 }
0x105a   : > { %v2769_v48 = vadd.f32 1.0, %v3899_v45 }
0x105b   : > { %v3901_v49 = vpop.eup %3900 }
0x105c   : > { %3906 = vrcp.f32 %v2769_v48  ;;  %v2770_v50 = vadd.f32 1.0, %v3901_v49 }
0x105e   : > { %3908 = vrcp.f32 %v2770_v50 }
0x1061   : > { %v3903_v51 = vpop.eup %3902 }
0x1062   : > { %v2771_v52 = vadd.f32 1.0, %v3903_v51 }
0x1063   : > { %v3905_v53 = vpop.eup %3904 }
0x1064   : > { %3910 = vrcp.f32 %v2771_v52  ;;  %v2772_v56 = vadd.f32 1.0, %v3905_v53 }
0x1066   : > { %v3907_v57 = vpop.eup %3906  ;;  %3912 = vrcp.f32 %v2772_v56 }
0x1067   : > { %v2781_v58 = vmul.f32 %v3907_v57, %v2738_v55 }
0x1068   : > { %v3909_v59 = vpop.eup %3908 }
0x1069   : > { %v2785_v60 = vmul.f32 %v2781_v58, %v2740_v4  ;;  %v2782_v61 = vmul.f32 %v3909_v59, %v2742_v54 }
0x106b   : > { %v2786_v62 = vmul.f32 %v2782_v61, %v2744_v10 }
0x106d   : > { %v2789_v63 = vpack.c.bf16 %v2786_v62, %v2785_v60 }
0x106e   : > { %v3911_v0 = vpop.eup %3910 }
0x106f   : > { %v2783_v1 = vmul.f32 %v3911_v0, %v2748_v39  ;;  %3527 = vmatprep.mubr.bf16.mxu0 %v2789_v63 }
0x1070   : > { %v3913_v2 = vpop.eup %3912 }
0x1071   : > { %v2787_v19 = vmul.f32 %v2783_v1, %v2750_v41  ;;  %v2784_v3 = vmul.f32 %v3913_v2, %v2752_v42 }
0x1073   : > { %v2788_v5 = vmul.f32 %v2784_v3, %v2754_v44 }
0x1075   : > { %v2790_v7 = vpack.c.bf16 %v2788_v5, %v2787_v19 }
0x1077   : > { %3528 = vmatmul.mubr.bf16.vlgmr.msra.gmra.mrb[16].mxu0 %v2790_v7 }
0x114a   : > { %v3529_v9 = vpop.f32.mrb[16].mxu0  ;;  %2915 = sbr.rel (%p3285_p12) target bundleno = 4652 (0x122c), region = 100 }
0x114b   : > { %v2906_v13 = vadd.f32 %v3529_v9, %v4714_v29  ;;  %v2889_v14 = vpop.f32.mrb[17].mxu0  ;;  %v2924_v29 = vld [vmem:[#allocation10] sm:$0xff] (!%p3285_p12) }
0x114c   : > { %v2904_v15 = vadd.f32 %v2889_v14, %v4712_v22  ;;  %v3530_v16 = vpop.f32.mrb[18].mxu0  ;;  %v2926_v22 = vld [vmem:[#allocation10 + $0x10] sm:$0xff] (!%p3285_p12)  ;;  %v3623_v25 = vpack.c.bf16 (!%p3285_p12), %v2925_v21, %v2924_v29 }
0x114d   : > { %2910 = vst.msk [vmem:[#allocation2 + $0x10] sm:$0xff] %vm687_vm1, %v2906_v13  ;;  %v2907_v17 = vadd.f32 %v3530_v16, %v4722_v35  ;;  %v2892_v18 = vpop.f32.mrb[19].mxu0  ;;  %v4131_v35 = vmov (!%p3285_p12), 0.0   ;;  %v3626_v24 = vpack.c.bf16 (!%p3285_p12), %v2927_v26, %v2926_v22 }
0x114e   : > { %2908 = vst.msk [vmem:[#allocation2] sm:$0xff] %vm687_vm1, %v2904_v15  ;;  %v2905_v20 = vadd.f32 %v2892_v18, %v4716_v32  ;;  %3539 = vmatprep.mubr.msk.f32.mxu0 (!%p3285_p12), %vm4130_vm8, %v4131_v35  ;;  %3624 = vmatpush3.bf16.msra.mxu0 (!%p3285_p12), %v3623_v25 }
0x114f   : > { %2911 = vst.msk [vmem:[#allocation2 + $0x18] sm:$0xff] %vm687_vm1, %v2907_v17  ;;  %v2920_v27 = vrot.slane (!%p3285_p12), %v2907_v17, 6  ;;  %3625 = vmatprep.subr.bf16.mxu0 (!%p3285_p12), %v4129_v23 }
0x1150   : > { %2909 = vst.msk [vmem:[#allocation2 + $0x8] sm:$0xff] %vm687_vm1, %v2905_v20  ;;  %v2917_v32 = vrot.slane (!%p3285_p12), %v2905_v20, 7 }
0x1152   : > { %3627 = vmatpush3.bf16.msra.mxu0 %v3626_v24  ;;  %v2923_v28 = vsel %vm2922_vm9, %v2917_v32, %v2920_v27 }
0x1155   : > { %3540 = vmatmul.mubr.msk.f32.vlgmr.msra.gmra.mrb[0].mxu0 %vm687_vm1, %v2923_v28 }
0x1228   : > { %v3004_v31 = vpop.f32.mrb[0].mxu0 }
0x1229   : > { %v3005_v33 = vadd.f32 %v3286_v30, %v3004_v31  ;;  %v3541_v34 = vpop.f32.mrb[1].mxu0 }
0x122b   : > { %3008 = vst [vmem:[#allocation12] sm:$0x3] %v3005_v33 }
0x122c PF: > { %p3663_p10 = scmp.eq.s32.totalorder %s4291_s14, 1  ;;  %s4132_s25 = smov [#allocation12]  }
0x122d   : > { %s3016_s22 = sshll.u32 %s4132_s25, 4  ;;  %s3017_s22 = int_to_ptr.vmem [resolvable:$true] %s3016_s22 }
0x122e   : > { %s4034_s29 = scalar_lea.vmem %s3017_s22, 32  ;;  %p4041_p0 = scmp.lt.s32.totalorder %s3017_s22, %s3017_s22 }
0x122f   : > { %p4035_p1 = scmp.ne.s32.totalorder %s3017_s22, %s4034_s29  ;;  %p4042_p4 = scmp.lt.s32.totalorder %s4034_s29, %s4034_s29 }
0x1231   : > { %p4036_p2 = pnand %p4035_p1, %p3663_p10  ;;  %p4043_p9 = por %p4042_p4, %p4041_p0 }
0x1233   : > { %p4037_p13 = pneg %p4036_p2 }
0x1235   : > { %p4044_p8 = pnand %p4043_p9, %p4037_p13 }
0x1237   : > { %4047 = shalt.err (!%p4044_p8)
}
0x1238   : > { %s4859_s8 = sld [smem:[#allocation26_spill]] }
0x123e   : > { %s4048_s15 = scalar_lea.hbm %s4859_s8, 32 }
0x123f   : > { %p4049_p11 = scmp.ne.s32.totalorder %s4859_s8, %s4048_s15  ;;  %p4054_p7 = scmp.lt.u32.totalorder %s4048_s15, %s4859_s8 }
0x1241   : > { %p4050_p5 = pnand %p4049_p11, %p3663_p10 }
0x1243   : > { %p4051_p3 = pneg %p4050_p5 }
0x1245   : > { %p4056_p6 = pnand %p4054_p7, %p4051_p3 }
0x1247   : > { %4059 = shalt.err (!%p4056_p6)
}
0x1248   : > { %3641 = dma.vmem_to_hbm [thread:$0]  (%p3663_p10), %s3017_s22, 32, %s4859_s8, [#allocation6]  }
0x1249   : > { %4089 = dma.done.wait (%p3663_p10), [#allocation6], 32  }
0x124a   : > { %4091 = vsyncadd (%p3663_p10), [#allocation6], 4294967264 }
0x124b PF: > { %s4860_s16 = sld [smem:[#allocation18_spill]]  ;;  %s4861_s19 = sld [smem:[#allocation17_spill]] }
0x124c   : > { %s4862_s15 = sld [smem:[#allocation19_spill]]  ;;  %s4863_s29 = smov %s4098_s30 }
0x1251   : > { %p27_p12 = scmp.ge.s32.totalorder %s4860_s16, 4   ;;  %s4864_s30 = smov %s4861_s19 }
0x1253   :  { %29 = sbr.rel (!%p27_p12) target bundleno = 14 (0xe), region = 165 }
0x125a   :  { %3029 = vsyncpa [#allocation5], 1 }
0x125b   :  { %3031 = vsyncpa [#allocation5 + $0x1], 1 }
0x125c   :  { %3032 = vsyncpa [#allocation8], 1 }
0x125d   :  { %3034 = vsyncpa [#allocation8 + $0x1], 1 }
0x125e   :  { %3035 = vsyncpa [#allocation11], 1 }
0x125f   :  { %3036 = vsyncpa [#allocation6], 1 }
0x1260   :  { %3038 = vsyncpa [#allocation6 + $0x1], 1 }

</bundles_post_ra>
